<compile_context>
chip_gen: v5e
topology: v5e:2x2
jax: 0.10.0
libtpu: 0.0.40
codegen_flags: <defaults>
</compile_context>

<pallas_src>
import functools

import jax
import jax.numpy as jnp
from jax.experimental import pallas as pl
from jax.experimental.pallas import tpu as pltpu

LN_EPS = 1e-5  # nn.LayerNorm default


def _round_up(x, m):
    return (x + m - 1) // m * m


def prenorm_kernel(x_ref, gamma_ref, beta_ref, w_ref, b_ref, o_ref,
                   *, d_true, mxu_dtype):
    # x_ref: (tm, Dp) rows; gamma/beta: (1, Dp); w_ref: (Dp, tn); b_ref: (1, tn)
    x = x_ref[...].astype(jnp.float32)
    dp = x.shape[-1]

    # --- LayerNorm over the true feature dim (Dp may be lane-padded) ---
    if dp == d_true:
        mean = jnp.mean(x, axis=-1, keepdims=True)
        centered = x - mean
        var = jnp.mean(centered * centered, axis=-1, keepdims=True)
    else:
        # Padded lanes of x are zero; mask them out of the statistics.
        valid = (jax.lax.broadcasted_iota(jnp.int32, (1, dp), 1) < d_true
                 ).astype(jnp.float32)
        inv_d = jnp.float32(1.0 / d_true)
        mean = jnp.sum(x, axis=-1, keepdims=True) * inv_d
        centered = (x - mean) * valid
        var = jnp.sum(centered * centered, axis=-1, keepdims=True) * inv_d

    x_hat = centered * jax.lax.rsqrt(var + LN_EPS)
    # gamma/beta are zero-padded, so padded lanes of y are exactly 0 and do
    # not contribute to the matmul.
    y = (x_hat * gamma_ref[...].astype(jnp.float32)
         + beta_ref[...].astype(jnp.float32))

    # --- fn: Linear(dim, dim) on the normalized activations (MXU, f32 acc) ---
    out = jnp.dot(y.astype(mxu_dtype), w_ref[...],
                  preferred_element_type=jnp.float32)
    out = out + b_ref[...].astype(jnp.float32)

    o_ref[...] = out.astype(o_ref.dtype)


def prenorm_linear(x, gamma, beta, w, b, *, tm=256, tn=512,
                   mxu_dtype=jnp.bfloat16):
    """x: (B, N, D).  Returns fn(LayerNorm(x)) with fn = Linear(D, D).

    w is in (in, out) layout, i.e. y_norm @ w + b  ==  PyTorch x @ W.T + b.
    """
    B, N, D = x.shape
    rows = B * N

    # Lane-dense feature dim and row tile (sublane-safe for f32 and bf16 outs).
    dp = _round_up(D, 128)
    tm = _round_up(max(tm, 16), 16)
    rows_pad = _round_up(rows, tm)

    # Output-column tile: largest multiple of 128 that divides dp and <= tn.
    tn_req = max(128, _round_up(tn, 128))
    m = dp // 128
    d = max(dd for dd in range(1, min(m, tn_req // 128) + 1) if m % dd == 0)
    tn = 128 * d

    # Zero-padded operands (padded rows/lanes are sliced off at the end).
    x2 = jnp.zeros((rows_pad, dp), x.dtype).at[:rows, :D].set(x.reshape(rows, D))
    gamma2 = jnp.zeros((1, dp), jnp.float32).at[:, :D].set(gamma.reshape(1, D))
    beta2 = jnp.zeros((1, dp), jnp.float32).at[:, :D].set(beta.reshape(1, D))
    w2 = jnp.zeros((dp, dp), mxu_dtype).at[:D, :D].set(w.astype(mxu_dtype))
    b2 = jnp.zeros((1, dp), jnp.float32).at[:, :D].set(b.reshape(1, D))

    grid = (rows_pad // tm, dp // tn)
    kernel = functools.partial(prenorm_kernel, d_true=D, mxu_dtype=mxu_dtype)

    bytes_accessed = int(
        x2.size * x2.dtype.itemsize                 # x streamed once
        + w2.size * w2.dtype.itemsize * grid[0]     # W re-read per row tile (worst case)
        + rows_pad * dp * x.dtype.itemsize          # output
        + 3 * dp * 4)                               # gamma/beta/bias
    cost = pl.CostEstimate(flops=2 * rows_pad * dp * dp + 8 * rows_pad * dp,
                           transcendentals=rows_pad,
                           bytes_accessed=bytes_accessed)

    out2 = pl.pallas_call(
        kernel,
        out_shape=jax.ShapeDtypeStruct((rows_pad, dp), x.dtype),
        grid_spec=pltpu.PrefetchScalarGridSpec(
            num_scalar_prefetch=0,
            grid=grid,
            in_specs=[
                pl.BlockSpec((tm, dp), lambda i, j: (i, 0)),   # x rows (full D for LN)
                pl.BlockSpec((1, dp), lambda i, j: (0, 0)),    # gamma
                pl.BlockSpec((1, dp), lambda i, j: (0, 0)),    # beta
                pl.BlockSpec((dp, tn), lambda i, j: (0, j)),   # W column tile
                pl.BlockSpec((1, tn), lambda i, j: (0, j)),    # bias tile
            ],
            out_specs=pl.BlockSpec((tm, tn), lambda i, j: (i, j)),
        ),
        compiler_params=pltpu.CompilerParams(
            dimension_semantics=("parallel", "parallel"),
            vmem_limit_bytes=48 * 1024 * 1024),
        cost_estimate=cost,
    )(x2, gamma2, beta2, w2, b2)

    return out2[:rows, :D].reshape(B, N, D)


def prenorm_reference(x, gamma, beta, w, b):
    xf = x.astype(jnp.float32)
    mean = jnp.mean(xf, axis=-1, keepdims=True)
    var = jnp.mean((xf - mean) ** 2, axis=-1, keepdims=True)
    y = (xf - mean) * jax.lax.rsqrt(var + LN_EPS) * gamma + beta
    return (y @ w + b).astype(x.dtype)


if __name__ == "__main__":
    key = jax.random.PRNGKey(0)
    B, N, D = 2, 8, 32  # batch, seq, hidden (PreNorm's `dim`)

    kx, kw, kb = jax.random.split(key, 3)
    x = jax.random.normal(kx, (B, N, D), dtype=jnp.float32)

    # LayerNorm params: PyTorch default init (weight=1, bias=0).
    gamma = jnp.ones((D,), dtype=jnp.float32)
    beta = jnp.zeros((D,), dtype=jnp.float32)

    # fn = Linear(D, D) params, deterministic, (in, out) layout.
    w = jax.random.normal(kw, (D, D), dtype=jnp.float32) * 0.02
    b = jax.random.normal(kb, (D,), dtype=jnp.float32) * 0.02

    ref = prenorm_reference(x, gamma, beta, w, b)

    # Default path: bf16 MXU operands, f32 accumulation.
    out = jax.block_until_ready(prenorm_linear(x, gamma, beta, w, b))
    assert out.shape == (B, N, D)
    assert jnp.allclose(out, ref, atol=1e-2, rtol=1e-2)

    # f32 MXU path matches the reference tightly.
    out_f32 = jax.block_until_ready(
        prenorm_linear(x, gamma, beta, w, b, mxu_dtype=jnp.float32))
    assert jnp.allclose(out_f32, ref, atol=1e-4, rtol=1e-4)

    print("KERNEL_OK")
</pallas_src>

<mosaic_0001>
module attributes {stable_mosaic.version = 11 : i64} {
  func.func @prenorm_kernel(%arg0: i32, %arg1: i32, %arg2: memref<256x128xf32, #tpu.memory_space<vmem>>, %arg3: memref<1x128xf32, #tpu.memory_space<vmem>>, %arg4: memref<1x128xf32, #tpu.memory_space<vmem>>, %arg5: memref<128x128xbf16, #tpu.memory_space<vmem>>, %arg6: memref<1x128xf32, #tpu.memory_space<vmem>>, %arg7: memref<256x128xf32, #tpu.memory_space<vmem>>) attributes {dimension_semantics = [#tpu.dimension_semantics<parallel>, #tpu.dimension_semantics<parallel>], iteration_bounds = array<i64: 1, 1>, scalar_prefetch = 0 : i64, scratch_operands = 0 : i64, tpu.core_type = #tpu.core_type<tc>, window_params = [{transform_indices = @transform_0, window_bounds = array<i64: 256, 128>}, {pipeline_mode = #tpu.pipeline_mode<synchronous>, transform_indices = @transform_1, window_bounds = array<i64: 1, 128>}, {pipeline_mode = #tpu.pipeline_mode<synchronous>, transform_indices = @transform_2, window_bounds = array<i64: 1, 128>}, {transform_indices = @transform_3, window_bounds = array<i64: 128, 128>}, {transform_indices = @transform_4, window_bounds = array<i64: 1, 128>}, {transform_indices = @transform_5, window_bounds = array<i64: 256, 128>}]} {
    %c0 = arith.constant 0 : index
    %c0_0 = arith.constant 0 : index
    %0 = vector.load %arg2[%c0, %c0_0] : memref<256x128xf32, #tpu.memory_space<vmem>>, vector<256x128xf32>
    %1 = tpu.iota {dimensions = array<i32: 1>} : vector<1x128xi32>
    %c32_i32 = arith.constant 32 : i32
    %2 = vector.broadcast %c32_i32 : i32 to vector<1x128xi32>
    %3 = arith.cmpi slt, %1, %2 : vector<1x128xi32>
    %4 = arith.extui %3 : vector<1x128xi1> to vector<1x128xi32>
    %5 = arith.sitofp %4 : vector<1x128xi32> to vector<1x128xf32>
    %cst = arith.constant dense<0.000000e+00> : vector<256xf32>
    %6 = vector.multi_reduction <add>, %0, %cst [1] : vector<256x128xf32> to vector<256xf32>
    %7 = vector.shape_cast %6 : vector<256xf32> to vector<256x1xf32>
    %cst_1 = arith.constant 3.125000e-02 : f32
    %8 = vector.broadcast %cst_1 : f32 to vector<256x1xf32>
    %9 = arith.mulf %7, %8 : vector<256x1xf32>
    %10 = vector.broadcast %9 : vector<256x1xf32> to vector<256x128xf32>
    %11 = arith.subf %0, %10 : vector<256x128xf32>
    %12 = vector.broadcast %5 : vector<1x128xf32> to vector<256x128xf32>
    %13 = arith.mulf %11, %12 : vector<256x128xf32>
    %14 = arith.mulf %13, %13 : vector<256x128xf32>
    %cst_2 = arith.constant dense<0.000000e+00> : vector<256xf32>
    %15 = vector.multi_reduction <add>, %14, %cst_2 [1] : vector<256x128xf32> to vector<256xf32>
    %16 = vector.shape_cast %15 : vector<256xf32> to vector<256x1xf32>
    %cst_3 = arith.constant 3.125000e-02 : f32
    %17 = vector.broadcast %cst_3 : f32 to vector<256x1xf32>
    %18 = arith.mulf %16, %17 : vector<256x1xf32>
    %cst_4 = arith.constant 9.99999974E-6 : f32
    %19 = vector.broadcast %cst_4 : f32 to vector<256x1xf32>
    %20 = arith.addf %18, %19 : vector<256x1xf32>
    %21 = math.rsqrt %20 : vector<256x1xf32>
    %22 = vector.broadcast %21 : vector<256x1xf32> to vector<256x128xf32>
    %23 = arith.mulf %13, %22 : vector<256x128xf32>
    %c0_5 = arith.constant 0 : index
    %c0_6 = arith.constant 0 : index
    %24 = vector.load %arg3[%c0_5, %c0_6] : memref<1x128xf32, #tpu.memory_space<vmem>>, vector<1x128xf32>
    %25 = vector.broadcast %24 : vector<1x128xf32> to vector<256x128xf32>
    %26 = arith.mulf %23, %25 : vector<256x128xf32>
    %c0_7 = arith.constant 0 : index
    %c0_8 = arith.constant 0 : index
    %27 = vector.load %arg4[%c0_7, %c0_8] : memref<1x128xf32, #tpu.memory_space<vmem>>, vector<1x128xf32>
    %28 = vector.broadcast %27 : vector<1x128xf32> to vector<256x128xf32>
    %29 = arith.addf %26, %28 : vector<256x128xf32>
    %30 = arith.truncf %29 : vector<256x128xf32> to vector<256x128xbf16>
    %c0_9 = arith.constant 0 : index
    %c0_10 = arith.constant 0 : index
    %31 = vector.load %arg5[%c0_9, %c0_10] : memref<128x128xbf16, #tpu.memory_space<vmem>>, vector<128x128xbf16>
    %cst_11 = arith.constant dense<0.000000e+00> : vector<256x128xf32>
    %32 = tpu.matmul %30, %31, %cst_11 {dimension_numbers = #tpu.dot_dimension_numbers<[1], [0], [0], [1], [0, 0, 1, 1], [], []>} : vector<256x128xbf16>, vector<128x128xbf16>, vector<256x128xf32> -> vector<256x128xf32>
    %c0_12 = arith.constant 0 : index
    %c0_13 = arith.constant 0 : index
    %33 = vector.load %arg6[%c0_12, %c0_13] : memref<1x128xf32, #tpu.memory_space<vmem>>, vector<1x128xf32>
    %34 = vector.broadcast %33 : vector<1x128xf32> to vector<256x128xf32>
    %35 = arith.addf %32, %34 : vector<256x128xf32>
    %c0_14 = arith.constant 0 : index
    %c0_15 = arith.constant 0 : index
    %36 = vector.load %arg7[%c0_14, %c0_15] : memref<256x128xf32, #tpu.memory_space<vmem>>, vector<256x128xf32>
    tpu.vector_store %arg7[%c0_14, %c0_15], %35 {strides = array<i32>} : memref<256x128xf32, #tpu.memory_space<vmem>>, vector<256x128xf32>,
    return
  }
  func.func @transform_0(%arg0: i32, %arg1: i32) -> (i32, i32) {
    %c0_i32 = arith.constant 0 : i32
    %c0_i32_0 = arith.constant 0 : i32
    return %arg0, %c0_i32 : i32, i32
  }
  func.func @transform_1(%arg0: i32, %arg1: i32) -> (i32, i32) {
    %c0_i32 = arith.constant 0 : i32
    %c0_i32_0 = arith.constant 0 : i32
    %c0_i32_1 = arith.constant 0 : i32
    return %c0_i32, %c0_i32_0 : i32, i32
  }
  func.func @transform_2(%arg0: i32, %arg1: i32) -> (i32, i32) {
    %c0_i32 = arith.constant 0 : i32
    %c0_i32_0 = arith.constant 0 : i32
    %c0_i32_1 = arith.constant 0 : i32
    return %c0_i32, %c0_i32_0 : i32, i32
  }
  func.func @transform_3(%arg0: i32, %arg1: i32) -> (i32, i32) {
    %c0_i32 = arith.constant 0 : i32
    %c0_i32_0 = arith.constant 0 : i32
    return %c0_i32, %arg1 : i32, i32
  }
  func.func @transform_4(%arg0: i32, %arg1: i32) -> (i32, i32) {
    %c0_i32 = arith.constant 0 : i32
    %c0_i32_0 = arith.constant 0 : i32
    return %c0_i32, %arg1 : i32, i32
  }
  func.func @transform_5(%arg0: i32, %arg1: i32) -> (i32, i32) {
    %c0_i32 = arith.constant 0 : i32
    return %arg0, %arg1 : i32, i32
  }
}

</mosaic_0001>

<bundles_post_ra>
// kernel: tpu_custom_call.1
= control target key start
LH: loop header
LB: loop body
LE: loop exit
PB: predicated region body
PF: predicated region fallthrough
CT: control target
= control target key end

     0   :  { %10 = vsyncpa [#allocation3], 0  ;;  %s2416_s0 = inlined_call_operand.hbm [shape: f32[256,128], index: 0, kind: input, shape index: {}]   ;;  %s2417_s1 = inlined_call_operand.hbm [shape: f32[1,128], index: 1, kind: input, shape index: {}]   ;;  %s2418_s2 = inlined_call_operand.vmem [shape: f32[1,128], index: 2, kind: input, shape index: {}]   ;;  %s2419_s3 = inlined_call_operand.hbm [shape: bf16[128,128], index: 3, kind: input, shape index: {}]   ;;  %s2420_s4 = inlined_call_operand.vmem [shape: f32[1,128], index: 4, kind: input, shape index: {}]   ;;  %s2421_s5 = inlined_call_operand.hbm [shape: f32[256,128], index: 5, kind: output, shape index: {}]  }
   0x1   :  { %11 = vsyncpa [#allocation6], 0  ;;  %s31_s20 = sshll.u32 %s2417_s1, 4  ;;  %s32_s20 = int_to_ptr.hbm [resolvable:$true] %s31_s20 }
   0x2   :  { %12 = vsyncpa [#allocation4], 0  ;;  %s1315_s21 = smov [#allocation5]   ;;  %s17_s25 = sshll.u32 %s2416_s0, 4  ;;  %s18_s25 = int_to_ptr.hbm [resolvable:$true] %s17_s25 }
   0x3   :  { %s33_s22 = sshll.u32 %s1315_s21, 4  ;;  %s1316_s26 = smov [#allocation2]   ;;  %s34_s22 = int_to_ptr.vmem [resolvable:$true] %s33_s22 }
   0x4   :  { %36 = dma.hbm_to_vmem [thread:$0]  %s32_s20, 16, %s34_s22, [#allocation6]  }
   0x5   :  { %s19_s27 = sshll.u32 %s1316_s26, 4  ;;  %s1317_s28 = smov 128   ;;  %s20_s27 = int_to_ptr.vmem [resolvable:$true] %s19_s27 }
   0x6   :  { %s1318_s29 = smov 8   ;;  %s43_s6 = sshll.u32 %s2419_s3, 4  ;;  %s44_s6 = int_to_ptr.hbm [resolvable:$true] %s43_s6 }
   0x7   :  { %25 = dma.hbm_to_vmem [thread:$0]  %s18_s25, 4096, %s20_s27, [#allocation3], %s1317_s28, %s1317_s28, %s1318_s29  }
   0x8   :  { %s1319_s7 = smov [#allocation7]   ;;  %s1320_s0 = smov 64  }
   0x9   :  { %s45_s8 = sshll.u32 %s1319_s7, 4  ;;  %s1321_s9 = smov 4   ;;  %s46_s8 = int_to_ptr.vmem [resolvable:$true] %s45_s8 }
   0xa   :  { %51 = dma.hbm_to_vmem [thread:$0]  %s44_s6, 1024, %s46_s8, [#allocation6], %s1320_s0, %s1320_s0, %s1321_s9  }
   0xb   :  { %1309 = dma.done.wait [#allocation3], 4096  }
   0xc   :  { %1310 = vsyncadd [#allocation3], 4294963200 }
   0xd   :  { %1311 = dma.done.wait [#allocation6], 1040  }
   0xe   :  { %1312 = vsyncadd [#allocation6], 4294966256  ;;  %v1366_v0 = vld [vmem:[#allocation2 + $0xc0] sm:$0xff]  ;;  %v1375_v3 = vld [vmem:[#allocation2 + $0xc8] sm:$0xff]  ;;  %v98_v32 = vlaneseq  ;;  %v1322_v39 = vmov 0.0   ;;  %s1058_s15 = sshll.u32 %s2421_s5, 4  ;;  %s1059_s15 = int_to_ptr.hbm [resolvable:$true] %s1058_s15 }
   0xf   :  { %v1368_v1 = vld [vmem:[#allocation2 + $0x80] sm:$0xff]  ;;  %151 = vadd.xlane.f32.xlu1 %v1366_v0  ;;  %v1377_v4 = vld [vmem:[#allocation2 + $0x88] sm:$0xff]  ;;  %v1388_v8 = vld [vmem:[#allocation2 + $0x90] sm:$0xff] }
  0x10   :  { %v1370_v2 = vld [vmem:[#allocation2] sm:$0xff]  ;;  %135 = vadd.xlane.f32.xlu0 %v1368_v1  ;;  %v1379_v5 = vld [vmem:[#allocation2 + $0x8] sm:$0xff]  ;;  %v1393_v9 = vld [vmem:[#allocation2 + $0xd0] sm:$0xff]  ;;  %v99_v33 = vand.u32 127, %v98_v32 }
  0x11   :  { %103 = vadd.xlane.f32.xlu2 %v1370_v2  ;;  %v1384_v6 = vld [vmem:[#allocation2 + $0x48] sm:$0xff]  ;;  %v1386_v7 = vld [vmem:[#allocation2 + $0x40] sm:$0xff]  ;;  %v1395_v10 = vld [vmem:[#allocation2 + $0x98] sm:$0xff] }
  0x12   :  { %v1397_v11 = vld [vmem:[#allocation2 + $0xd8] sm:$0xff]  ;;  %v1404_v13 = vld [vmem:[#allocation2 + $0x10] sm:$0xff]  ;;  %v1411_v15 = vld [vmem:[#allocation2 + $0xa0] sm:$0xff]  ;;  %vm100_vm0 = vcmp.lt.s32.totalorder %v99_v33, 32 }
  0x13   :  { %v1402_v12 = vld [vmem:[#allocation2 + $0x18] sm:$0xff]  ;;  %v1406_v14 = vld [vmem:[#allocation2 + $0x50] sm:$0xff]  ;;  %v1415_v17 = vld [vmem:[#allocation2 + $0xa8] sm:$0xff]  ;;  %v1462_v40 = vsel %vm100_vm0, 1.0, %v1322_v39 }
  0x14   :  { %v1413_v16 = vld [vmem:[#allocation2 + $0x58] sm:$0xff]  ;;  %v1420_v18 = vld [vmem:[#allocation2 + $0xe8] sm:$0xff]  ;;  %v1422_v19 = vld [vmem:[#allocation2 + $0xe0] sm:$0xff] }
  0x15   :  { %v1424_v20 = vld [vmem:[#allocation2 + $0x20] sm:$0xff]  ;;  %v1431_v22 = vld [vmem:[#allocation2 + $0x28] sm:$0xff]  ;;  %v1438_v24 = vld [vmem:[#allocation2 + $0xb8] sm:$0xff] }
  0x16   :  { %v1429_v21 = vld [vmem:[#allocation2 + $0x60] sm:$0xff]  ;;  %v1433_v23 = vld [vmem:[#allocation2 + $0x68] sm:$0xff]  ;;  %v1440_v25 = vld [vmem:[#allocation2 + $0xb0] sm:$0xff] }
  0x17   :  { %153 = vadd.xlane.f32.xlu1 %v1375_v3  ;;  %v1442_v26 = vld [vmem:[#allocation2 + $0xf0] sm:$0xff]  ;;  %v1447_v27 = vld [vmem:[#allocation2 + $0xf8] sm:$0xff] }
  0x18   :  { %137 = vadd.xlane.f32.xlu0 %v1377_v4  ;;  %v1449_v28 = vld [vmem:[#allocation2 + $0x70] sm:$0xff]  ;;  %v1456_v30 = vld [vmem:[#allocation2 + $0x38] sm:$0xff] }
  0x19   :  { %105 = vadd.xlane.f32.xlu2 %v1379_v5  ;;  %v1451_v29 = vld [vmem:[#allocation2 + $0x30] sm:$0xff]  ;;  %v1458_v31 = vld [vmem:[#allocation2 + $0x78] sm:$0xff] }
  0x1f   :  { %121 = vadd.xlane.f32.xlu1 %v1384_v6 }
  0x20   :  { %119 = vadd.xlane.f32.xlu0 %v1386_v7 }
  0x21   :  { %139 = vadd.xlane.f32.xlu2 %v1388_v8 }
  0x27   :  { %155 = vadd.xlane.f32.xlu1 %v1393_v9 }
  0x28   :  { %141 = vadd.xlane.f32.xlu0 %v1395_v10 }
  0x29   :  { %157 = vadd.xlane.f32.xlu2 %v1397_v11 }
  0x2f   :  { %109 = vadd.xlane.f32.xlu1 %v1402_v12 }
  0x30   :  { %107 = vadd.xlane.f32.xlu0 %v1404_v13 }
  0x31   :  { %123 = vadd.xlane.f32.xlu2 %v1406_v14 }
  0x37   :  { %143 = vadd.xlane.f32.xlu1 %v1411_v15 }
  0x38   :  { %125 = vadd.xlane.f32.xlu0 %v1413_v16 }
  0x39   :  { %145 = vadd.xlane.f32.xlu2 %v1415_v17 }
  0x3f   :  { %161 = vadd.xlane.f32.xlu1 %v1420_v18 }
  0x40   :  { %159 = vadd.xlane.f32.xlu0 %v1422_v19 }
  0x41   :  { %111 = vadd.xlane.f32.xlu2 %v1424_v20 }
  0x47   :  { %127 = vadd.xlane.f32.xlu1 %v1429_v21 }
  0x48   :  { %113 = vadd.xlane.f32.xlu0 %v1431_v22 }
  0x49   :  { %129 = vadd.xlane.f32.xlu2 %v1433_v23 }
  0x4f   :  { %149 = vadd.xlane.f32.xlu1 %v1438_v24 }
  0x50   :  { %147 = vadd.xlane.f32.xlu0 %v1440_v25 }
  0x51   :  { %163 = vadd.xlane.f32.xlu2 %v1442_v26 }
  0x57   :  { %131 = vadd.xlane.f32.xlu1 %v1449_v28 }
  0x58   :  { %165 = vadd.xlane.f32.xlu0 %v1447_v27 }
  0x59   :  { %115 = vadd.xlane.f32.xlu2 %v1451_v29 }
  0x60   :  { %117 = vadd.xlane.f32.xlu0 %v1456_v30 }
  0x61   :  { %133 = vadd.xlane.f32.xlu2 %v1458_v31 }
  0x82   :  { %v152_v34 = vpop.xlane.xlu1 %151 }
  0x83   :  { %v136_v35 = vpop.xlane.xlu0 %135  ;;  %v191_v36 = vmul.f32 0.03125, %v152_v34 }
  0x84   :  { %v183_v37 = vmul.f32 0.03125, %v136_v35  ;;  %v104_v38 = vpop.xlane.xlu2 %103 }
  0x85   :  { %v223_v41 = vsub.f32 %v1366_v0, %v191_v36  ;;  %v167_v43 = vmul.f32 0.03125, %v104_v38 }
  0x86   :  { %v215_v42 = vsub.f32 %v1368_v1, %v183_v37 }
  0x87   :  { %v1470_v45 = vmul.f32 %v1462_v40, %v223_v41  ;;  %v199_v48 = vsub.f32 %v1370_v2, %v167_v43 }
  0x88   :  { %v1467_v44 = vmul.f32 %v1462_v40, %v215_v42 }
  0x89   :  { %v287_v47 = vmul.f32 %v1470_v45, %v1470_v45  ;;  %v1480_v57 = vmul.f32 %v1462_v40, %v199_v48 }
  0x8a   :  { %v279_v46 = vmul.f32 %v1467_v44, %v1467_v44  ;;  %v154_v49 = vpop.xlane.xlu1 %153 }
  0x8b   :  { %v138_v50 = vpop.xlane.xlu0 %137  ;;  %v192_v51 = vmul.f32 0.03125, %v154_v49  ;;  %343 = vadd.xlane.f32.xlu0 %v287_v47  ;;  %v263_v1 = vmul.f32 %v1480_v57, %v1480_v57 }
  0x8c   :  { %v184_v52 = vmul.f32 0.03125, %v138_v50  ;;  %v106_v53 = vpop.xlane.xlu2 %105  ;;  %327 = vadd.xlane.f32.xlu1 %v279_v46 }
  0x8d   :  { %v224_v54 = vsub.f32 %v1375_v3, %v192_v51  ;;  %v168_v56 = vmul.f32 0.03125, %v106_v53 }
  0x8e   :  { %v216_v55 = vsub.f32 %v1377_v4, %v184_v52 }
  0x8f   :  { %v1483_v58 = vmul.f32 %v1462_v40, %v224_v54  ;;  %v200_v60 = vsub.f32 %v1379_v5, %v168_v56 }
  0x90   :  { %v1486_v59 = vmul.f32 %v1462_v40, %v216_v55 }
  0x91   :  { %v288_v61 = vmul.f32 %v1483_v58, %v1483_v58  ;;  %v1498_v34 = vmul.f32 %v1462_v40, %v200_v60 }
  0x92   :  { %v280_v62 = vmul.f32 %v1486_v59, %v1486_v59  ;;  %v122_v63 = vpop.xlane.xlu1 %121 }
  0x93   :  { %v120_v0 = vpop.xlane.xlu0 %119  ;;  %v176_v2 = vmul.f32 0.03125, %v122_v63  ;;  %295 = vadd.xlane.f32.xlu0 %v263_v1 }
  0x94   :  { %v175_v3 = vmul.f32 0.03125, %v120_v0  ;;  %v140_v4 = vpop.xlane.xlu2 %139  ;;  %345 = vadd.xlane.f32.xlu1 %v288_v61  ;;  %329 = vadd.xlane.f32.xlu2 %v280_v62 }
  0x95   :  { %v208_v32 = vsub.f32 %v1384_v6, %v176_v2  ;;  %v185_v33 = vmul.f32 0.03125, %v140_v4 }
  0x96   :  { %v207_v5 = vsub.f32 %v1386_v7, %v175_v3  ;;  %v264_v7 = vmul.f32 %v1498_v34, %v1498_v34 }
  0x97   :  { %v1504_v36 = vmul.f32 %v1462_v40, %v208_v32  ;;  %v217_v37 = vsub.f32 %v1388_v8, %v185_v33 }
  0x98   :  { %v1501_v35 = vmul.f32 %v1462_v40, %v207_v5 }
  0x99   :  { %v272_v6 = vmul.f32 %v1504_v36, %v1504_v36  ;;  %v1516_v49 = vmul.f32 %v1462_v40, %v217_v37 }
  0x9a   :  { %v271_v38 = vmul.f32 %v1501_v35, %v1501_v35  ;;  %v156_v39 = vpop.xlane.xlu1 %155 }
  0x9b   :  { %v142_v41 = vpop.xlane.xlu0 %141  ;;  %v193_v42 = vmul.f32 0.03125, %v156_v39  ;;  %313 = vadd.xlane.f32.xlu0 %v272_v6 }
  0x9c   :  { %v186_v43 = vmul.f32 0.03125, %v142_v41  ;;  %v158_v46 = vpop.xlane.xlu2 %157  ;;  %311 = vadd.xlane.f32.xlu2 %v271_v38  ;;  %297 = vadd.xlane.f32.xlu1 %v264_v7 }
  0x9d   :  { %v225_v47 = vsub.f32 %v1393_v9, %v193_v42  ;;  %v194_v48 = vmul.f32 0.03125, %v158_v46 }
  0x9e   :  { %v218_v8 = vsub.f32 %v1395_v10, %v186_v43  ;;  %v281_v10 = vmul.f32 %v1516_v49, %v1516_v49 }
  0x9f   :  { %v1522_v51 = vmul.f32 %v1462_v40, %v225_v47  ;;  %v226_v52 = vsub.f32 %v1397_v11, %v194_v48 }
  0xa0   :  { %v1519_v50 = vmul.f32 %v1462_v40, %v218_v8 }
  0xa1   :  { %v289_v9 = vmul.f32 %v1522_v51, %v1522_v51  ;;  %v1534_v0 = vmul.f32 %v1462_v40, %v226_v52 }
  0xa2   :  { %v282_v53 = vmul.f32 %v1519_v50, %v1519_v50  ;;  %v110_v54 = vpop.xlane.xlu1 %109 }
  0xa3   :  { %v108_v55 = vpop.xlane.xlu0 %107  ;;  %v170_v56 = vmul.f32 0.03125, %v110_v54  ;;  %347 = vadd.xlane.f32.xlu0 %v289_v9 }
  0xa4   :  { %v169_v60 = vmul.f32 0.03125, %v108_v55  ;;  %v124_v61 = vpop.xlane.xlu2 %123  ;;  %333 = vadd.xlane.f32.xlu2 %v282_v53  ;;  %331 = vadd.xlane.f32.xlu1 %v281_v10 }
  0xa5   :  { %v202_v62 = vsub.f32 %v1402_v12, %v170_v56  ;;  %v177_v63 = vmul.f32 0.03125, %v124_v61 }
  0xa6   :  { %v201_v11 = vsub.f32 %v1404_v13, %v169_v60  ;;  %v290_v13 = vmul.f32 %v1534_v0, %v1534_v0 }
  0xa7   :  { %v1540_v2 = vmul.f32 %v1462_v40, %v202_v62  ;;  %v209_v3 = vsub.f32 %v1406_v14, %v177_v63 }
  0xa8   :  { %v1537_v1 = vmul.f32 %v1462_v40, %v201_v11 }
  0xa9   :  { %v266_v12 = vmul.f32 %v1540_v2, %v1540_v2  ;;  %v1552_v39 = vmul.f32 %v1462_v40, %v209_v3 }
  0xaa   :  { %v265_v4 = vmul.f32 %v1537_v1, %v1537_v1  ;;  %v144_v32 = vpop.xlane.xlu1 %143 }
  0xab   :  { %v126_v5 = vpop.xlane.xlu0 %125  ;;  %v187_v33 = vmul.f32 0.03125, %v144_v32  ;;  %301 = vadd.xlane.f32.xlu0 %v266_v12 }
  0xac   :  { %v178_v37 = vmul.f32 0.03125, %v126_v5  ;;  %v146_v38 = vpop.xlane.xlu2 %145  ;;  %299 = vadd.xlane.f32.xlu2 %v265_v4  ;;  %349 = vadd.xlane.f32.xlu1 %v290_v13 }
  0xad   :  { %v219_v6 = vsub.f32 %v1411_v15, %v187_v33  ;;  %v188_v7 = vmul.f32 0.03125, %v146_v38 }
  0xae   :  { %v210_v14 = vsub.f32 %v1413_v16, %v178_v37  ;;  %v273_v16 = vmul.f32 %v1552_v39, %v1552_v39 }
  0xaf   :  { %v1558_v42 = vmul.f32 %v1462_v40, %v219_v6  ;;  %v220_v43 = vsub.f32 %v1415_v17, %v188_v7 }
  0xb0   :  { %v1555_v41 = vmul.f32 %v1462_v40, %v210_v14 }
  0xb1   :  { %v283_v15 = vmul.f32 %v1558_v42, %v1558_v42  ;;  %v1570_v54 = vmul.f32 %v1462_v40, %v220_v43 }
  0xb2   :  { %v274_v46 = vmul.f32 %v1555_v41, %v1555_v41  ;;  %v162_v47 = vpop.xlane.xlu1 %161 }
  0xb3   :  { %v160_v8 = vpop.xlane.xlu0 %159  ;;  %v196_v48 = vmul.f32 0.03125, %v162_v47  ;;  %335 = vadd.xlane.f32.xlu0 %v283_v15 }
  0xb4   :  { %v195_v52 = vmul.f32 0.03125, %v160_v8  ;;  %v112_v53 = vpop.xlane.xlu2 %111  ;;  %317 = vadd.xlane.f32.xlu2 %v274_v46  ;;  %315 = vadd.xlane.f32.xlu1 %v273_v16 }
  0xb5   :  { %v228_v9 = vsub.f32 %v1420_v18, %v196_v48  ;;  %v171_v10 = vmul.f32 0.03125, %v112_v53 }
  0xb6   :  { %v227_v17 = vsub.f32 %v1422_v19, %v195_v52  ;;  %v284_v19 = vmul.f32 %v1570_v54, %v1570_v54 }
  0xb7   :  { %v1576_v56 = vmul.f32 %v1462_v40, %v228_v9  ;;  %v203_v60 = vsub.f32 %v1424_v20, %v171_v10 }
  0xb8   :  { %v1573_v55 = vmul.f32 %v1462_v40, %v227_v17 }
  0xb9   :  { %v292_v18 = vmul.f32 %v1576_v56, %v1576_v56  ;;  %v1588_v32 = vmul.f32 %v1462_v40, %v203_v60 }
  0xba   :  { %v291_v61 = vmul.f32 %v1573_v55, %v1573_v55  ;;  %v128_v62 = vpop.xlane.xlu1 %127 }
  0xbb   :  { %v114_v11 = vpop.xlane.xlu0 %113  ;;  %v179_v63 = vmul.f32 0.03125, %v128_v62  ;;  %353 = vadd.xlane.f32.xlu0 %v292_v18 }
  0xbc   :  { %v172_v3 = vmul.f32 0.03125, %v114_v11  ;;  %v130_v4 = vpop.xlane.xlu2 %129  ;;  %351 = vadd.xlane.f32.xlu2 %v291_v61  ;;  %337 = vadd.xlane.f32.xlu1 %v284_v19 }
  0xbd   :  { %v211_v12 = vsub.f32 %v1429_v21, %v179_v63  ;;  %v180_v13 = vmul.f32 0.03125, %v130_v4 }
  0xbe   :  { %v204_v20 = vsub.f32 %v1431_v22, %v172_v3  ;;  %v267_v22 = vmul.f32 %v1588_v32, %v1588_v32 }
  0xbf   :  { %v1594_v33 = vmul.f32 %v1462_v40, %v211_v12  ;;  %v212_v37 = vsub.f32 %v1433_v23, %v180_v13 }
  0xc0   :  { %v1591_v5 = vmul.f32 %v1462_v40, %v204_v20 }
  0xc1   :  { %v275_v21 = vmul.f32 %v1594_v33, %v1594_v33  ;;  %v1606_v47 = vmul.f32 %v1462_v40, %v212_v37 }
  0xc2   :  { %v268_v38 = vmul.f32 %v1591_v5, %v1591_v5  ;;  %v150_v6 = vpop.xlane.xlu1 %149 }
  0xc3   :  { %v148_v14 = vpop.xlane.xlu0 %147  ;;  %v190_v7 = vmul.f32 0.03125, %v150_v6  ;;  %319 = vadd.xlane.f32.xlu0 %v275_v21 }
  0xc4   :  { %v189_v43 = vmul.f32 0.03125, %v148_v14  ;;  %v164_v46 = vpop.xlane.xlu2 %163  ;;  %305 = vadd.xlane.f32.xlu2 %v268_v38  ;;  %303 = vadd.xlane.f32.xlu1 %v267_v22 }
  0xc5   :  { %v222_v15 = vsub.f32 %v1438_v24, %v190_v7  ;;  %v197_v16 = vmul.f32 0.03125, %v164_v46  ;;  %v1109_v46 = vld [vmem:[#allocation7 + $0x20] sm:$0xff] }
  0xc6   :  { %v221_v23 = vsub.f32 %v1440_v25, %v189_v43  ;;  %v276_v25 = vmul.f32 %v1606_v47, %v1606_v47 }
  0xc7   :  { %v1612_v48 = vmul.f32 %v1462_v40, %v222_v15  ;;  %v229_v52 = vsub.f32 %v1442_v26, %v197_v16  ;;  %v1108_v15 = vld [vmem:[#allocation7 + $0x18] sm:$0xff] }
  0xc8   :  { %v1609_v8 = vmul.f32 %v1462_v40, %v221_v23  ;;  %v1107_v23 = vld [vmem:[#allocation7 + $0x10] sm:$0xff] }
  0xc9   :  { %2429 = vst [vmem:[#allocation12_spill] sm:$0xff] %v1612_v48  ;;  %v286_v24 = vmul.f32 %v1612_v48, %v1612_v48  ;;  %v1623_v19 = vmul.f32 %v1462_v40, %v229_v52 }
  0xca   :  { %v285_v53 = vmul.f32 %v1609_v8, %v1609_v8  ;;  %v132_v17 = vpop.xlane.xlu1 %131 }
  0xcb   :  { %v166_v9 = vpop.xlane.xlu0 %165  ;;  %v181_v61 = vmul.f32 0.03125, %v132_v17  ;;  %341 = vadd.xlane.f32.xlu0 %v286_v24  ;;  %2430 = vst [vmem:[#allocation13_spill] sm:$0xff] %v1623_v19  ;;  %v293_v12 = vmul.f32 %v1623_v19, %v1623_v19 }
  0xcc   :  { %v198_v10 = vmul.f32 0.03125, %v166_v9  ;;  %v116_v60 = vpop.xlane.xlu2 %115  ;;  %339 = vadd.xlane.f32.xlu2 %v285_v53  ;;  %321 = vadd.xlane.f32.xlu1 %v276_v25  ;;  %v1106_v25 = vld [vmem:[#allocation7 + $0x8] sm:$0xff] }
  0xcd   :  { %v173_v18 = vmul.f32 0.03125, %v116_v60  ;;  %v213_v11 = vsub.f32 %v1449_v28, %v181_v61 }
  0xce   :  { %v230_v26 = vsub.f32 %v1447_v27, %v198_v10  ;;  %v1105_v10 = vld [vmem:[#allocation7] sm:$0xff] }
  0xcf   :  { %v205_v62 = vsub.f32 %v1451_v29, %v173_v18  ;;  %v1640_v28 = vmul.f32 %v1462_v40, %v213_v11 }
  0xd0   :  { %v1628_v63 = vmul.f32 %v1462_v40, %v230_v26 }
  0xd1   :  { %v1631_v3 = vmul.f32 %v1462_v40, %v205_v62  ;;  %2433 = vst [vmem:[#allocation16_spill] sm:$0xff] %v1640_v28  ;;  %v277_v22 = vmul.f32 %v1640_v28, %v1640_v28 }
  0xd2   :  { %2431 = vst [vmem:[#allocation14_spill] sm:$0xff] %v1628_v63  ;;  %v294_v4 = vmul.f32 %v1628_v63, %v1628_v63 }
  0xd3   :  { %2432 = vst [vmem:[#allocation15_spill] sm:$0xff] %v1631_v3  ;;  %v118_v27 = vpop.xlane.xlu0 %117  ;;  %v269_v20 = vmul.f32 %v1631_v3, %v1631_v3  ;;  %v1743_v3 = vld [vmem:[#allocation5] ss:$0 sm:$0xff] }
  0xd4   :  { %v174_v13 = vmul.f32 0.03125, %v118_v27  ;;  %v134_v29 = vpop.xlane.xlu2 %133  ;;  %357 = vadd.xlane.f32.xlu2 %v294_v4  ;;  %355 = vadd.xlane.f32.xlu1 %v293_v12 }
  0xd5   :  { %v182_v37 = vmul.f32 0.03125, %v134_v29  ;;  %307 = vadd.xlane.f32.xlu0 %v269_v20 }
  0xd6   :  { %v206_v38 = vsub.f32 %v1456_v30, %v174_v13  ;;  %v1112_v30 = vld [vmem:[#allocation7 + $0x38] sm:$0xff] }
  0xd7   :  { %v214_v21 = vsub.f32 %v1458_v31, %v182_v37  ;;  %1114 = vmatpush.bf16.msra.mxu2 %v1112_v30  ;;  %1115 = vmatpush.bf16.msra.mxu3 %v1112_v30  ;;  %v1111_v31 = vld [vmem:[#allocation7 + $0x30] sm:$0xff] }
  0xd8   :  { %v1647_v6 = vmul.f32 %v1462_v40, %v206_v38  ;;  %931 = vmatpush.bf16.msra.mxu0 %v1112_v30  ;;  %1113 = vmatpush.bf16.msra.mxu1 %v1112_v30 }
  0xd9   :  { %v1650_v14 = vmul.f32 %v1462_v40, %v214_v21  ;;  %v1110_v40 = vld [vmem:[#allocation7 + $0x28] sm:$0xff] }
  0xda   :  { %2434 = vst [vmem:[#allocation17_spill] sm:$0xff] %v1647_v6  ;;  %v270_v7 = vmul.f32 %v1647_v6, %v1647_v6 }
  0xdb   :  { %2435 = vst [vmem:[#allocation18_spill] sm:$0xff] %v1650_v14  ;;  %v278_v43 = vmul.f32 %v1650_v14, %v1650_v14  ;;  %1117 = vmatpush.bf16.msra.mxu2 %v1111_v31  ;;  %1118 = vmatpush.bf16.msra.mxu3 %v1111_v31 }
  0xdc   :  { %323 = vadd.xlane.f32.xlu2 %v277_v22  ;;  %309 = vadd.xlane.f32.xlu1 %v270_v7 }
  0xdd   :  { %325 = vadd.xlane.f32.xlu0 %v278_v43  ;;  %932 = vmatpush.bf16.msra.mxu0 %v1111_v31 }
  0xde   :  { %1116 = vmatpush.bf16.msra.mxu1 %v1111_v31 }
  0xdf   :  { %1120 = vmatpush.bf16.msra.mxu2 %v1110_v40  ;;  %1121 = vmatpush.bf16.msra.mxu3 %v1110_v40 }
  0xe1   :  { %933 = vmatpush.bf16.msra.mxu0 %v1110_v40 }
  0xe2   :  { %1119 = vmatpush.bf16.msra.mxu1 %v1110_v40 }
  0xe3   :  { %1123 = vmatpush.bf16.msra.mxu2 %v1109_v46  ;;  %1124 = vmatpush.bf16.msra.mxu3 %v1109_v46 }
  0xe5   :  { %934 = vmatpush.bf16.msra.mxu0 %v1109_v46 }
  0xe6   :  { %1122 = vmatpush.bf16.msra.mxu1 %v1109_v46 }
  0xe7   :  { %1126 = vmatpush.bf16.msra.mxu2 %v1108_v15  ;;  %1127 = vmatpush.bf16.msra.mxu3 %v1108_v15 }
  0xe9   :  { %935 = vmatpush.bf16.msra.mxu0 %v1108_v15 }
  0xea   :  { %1125 = vmatpush.bf16.msra.mxu1 %v1108_v15 }
  0xeb   :  { %1129 = vmatpush.bf16.msra.mxu2 %v1107_v23  ;;  %1130 = vmatpush.bf16.msra.mxu3 %v1107_v23 }
  0xed   :  { %936 = vmatpush.bf16.msra.mxu0 %v1107_v23 }
  0xee   :  { %1128 = vmatpush.bf16.msra.mxu1 %v1107_v23 }
  0xef   :  { %1132 = vmatpush.bf16.msra.mxu2 %v1106_v25  ;;  %1133 = vmatpush.bf16.msra.mxu3 %v1106_v25 }
  0xf1   :  { %937 = vmatpush.bf16.msra.mxu0 %v1106_v25 }
  0xf2   :  { %1131 = vmatpush.bf16.msra.mxu1 %v1106_v25 }
  0xf3   :  { %1135 = vmatpush.bf16.msra.mxu2 %v1105_v10  ;;  %1136 = vmatpush.bf16.msra.mxu3 %v1105_v10 }
  0xf5   :  { %938 = vmatpush.bf16.msra.mxu0 %v1105_v10 }
  0xf6   :  { %1134 = vmatpush.bf16.msra.mxu1 %v1105_v10 }
  0xfe   :  { %v344_v52 = vpop.xlane.xlu0 %343 }
  0xff   :  { %v328_v16 = vpop.xlane.xlu1 %327  ;;  %v383_v24 = vmul.f32 0.03125, %v344_v52 }
 0x100   :  { %v375_v53 = vmul.f32 0.03125, %v328_v16 }
 0x101   :  { %v1658_v17 = vadd.f32 1e-05, %v383_v24 }
 0x102   :  { %v1656_v9 = vadd.f32 1e-05, %v375_v53 }
 0x103   :  { %vm669_vm8 = vweird.f32 %v1658_v17 }
 0x104   :  { %1149 = vrsqrt.f32 %v1656_v9  ;;  %vm589_vm2 = vweird.f32 %v1656_v9 }
 0x105   :  { %1151 = vrsqrt.f32 %v1658_v17 }
 0x106   :  { %v296_v26 = vpop.xlane.xlu0 %295 }
 0x107   :  { %v346_v60 = vpop.xlane.xlu1 %345  ;;  %v330_v61 = vpop.xlane.xlu2 %329  ;;  %v359_v11 = vmul.f32 0.03125, %v296_v26 }
 0x108   :  { %v384_v18 = vmul.f32 0.03125, %v346_v60  ;;  %v376_v62 = vmul.f32 0.03125, %v330_v61 }
 0x109   :  { %v1673_v29 = vadd.f32 1e-05, %v359_v11 }
 0x10a   :  { %v1662_v4 = vpop.eup %1149  ;;  %v1664_v12 = vadd.f32 1e-05, %v384_v18  ;;  %v1666_v27 = vadd.f32 1e-05, %v376_v62 }
 0x10b   :  { %v1668_v20 = vpop.eup %1151  ;;  %v584_v13 = vmul.f32 %v1662_v4, %v1656_v9  ;;  %vm590_vm1 = vweird.f32 %v1662_v4  ;;  %vm429_vm13 = vweird.f32 %v1673_v29 }
 0x10c   :  { %1153 = vrsqrt.f32 %v1664_v12  ;;  %v664_v37 = vmul.f32 %v1668_v20, %v1658_v17  ;;  %vm1713_vm4 = vmor %vm589_vm2, %vm590_vm1  ;;  %vm670_vm5 = vweird.f32 %v1668_v20  ;;  %vm599_vm6 = vweird.f32 %v1666_v27 }
 0x10d   :  { %1155 = vrsqrt.f32 %v1666_v27  ;;  %v585_v38 = vmul.f32 %v1662_v4, %v584_v13  ;;  %vm1750_vm9 = vmor %vm669_vm8, %vm670_vm5  ;;  %vm679_vm11 = vweird.f32 %v1664_v12 }
 0x10e   :  { %v314_v7 = vpop.xlane.xlu0 %313  ;;  %1157 = vrsqrt.f32 %v1673_v29  ;;  %v665_v46 = vmul.f32 %v1668_v20, %v664_v37 }
 0x10f   :  { %v298_v21 = vpop.xlane.xlu1 %297  ;;  %v312_v22 = vpop.xlane.xlu2 %311  ;;  %v368_v31 = vmul.f32 0.03125, %v314_v7  ;;  %v586_v23 = vmul.f32 0.5, %v585_v38 }
 0x110   :  { %v360_v43 = vmul.f32 0.03125, %v298_v21  ;;  %v367_v30 = vmul.f32 0.03125, %v312_v22  ;;  %v666_v10 = vmul.f32 0.5, %v665_v46 }
 0x111   :  { %v1687_v52 = vadd.f32 1e-05, %v368_v31  ;;  %v587_v61 = vsub.f32 1.5, %v586_v23 }
 0x112   :  { %v1680_v40 = vpop.eup %1153  ;;  %v1683_v15 = vadd.f32 1e-05, %v360_v43  ;;  %v1689_v53 = vadd.f32 1e-05, %v367_v30  ;;  %v667_v22 = vsub.f32 1.5, %v666_v10 }
 0x113   :  { %v674_v16 = vmul.f32 %v1680_v40, %v1664_v12  ;;  %v1156_v24 = vpop.eup %1155  ;;  %v588_v30 = vmul.f32 %v1662_v4, %v587_v61  ;;  %vm680_vm10 = vweird.f32 %v1680_v40  ;;  %vm519_vm1 = vweird.f32 %v1687_v52 }
 0x114   :  { %v594_v25 = vmul.f32 %v1156_v24, %v1666_v27  ;;  %1159 = vrsqrt.f32 %v1683_v15  ;;  %v1694_v60 = vpop.eup %1157  ;;  %vm600_vm3 = vweird.f32 %v1156_v24  ;;  %v668_v61 = vmul.f32 %v1668_v20, %v667_v22  ;;  %vm1778_vm12 = vmor %vm679_vm11, %vm680_vm10 }
 0x115   :  { %1161 = vrsqrt.f32 %v1687_v52  ;;  %v675_v18 = vmul.f32 %v1680_v40, %v674_v16  ;;  %v424_v7 = vmul.f32 %v1694_v60, %v1673_v29  ;;  %vm1728_vm7 = vmor %vm599_vm6, %vm600_vm3  ;;  %vm430_vm14 = vweird.f32 %v1694_v60 }
 0x116   :  { %v595_v26 = vmul.f32 %v1156_v24, %v594_v25  ;;  %1163 = vrsqrt.f32 %v1689_v53  ;;  %v348_v13 = vpop.xlane.xlu0 %347  ;;  %vm439_vm15 = vweird.f32 %v1683_v15  ;;  %vm509_vm0 = vweird.f32 %v1689_v53  ;;  %vm1833_vm5 = vmor %vm429_vm13, %vm430_vm14 }
 0x117   :  { %v332_v62 = vpop.xlane.xlu1 %331  ;;  %v334_v11 = vpop.xlane.xlu2 %333  ;;  %v676_v31 = vmul.f32 0.5, %v675_v18  ;;  %v385_v16 = vmul.f32 0.03125, %v348_v13  ;;  %v425_v18 = vmul.f32 %v1694_v60, %v424_v7 }
 0x118   :  { %v377_v37 = vmul.f32 0.03125, %v332_v62  ;;  %v596_v38 = vmul.f32 0.5, %v595_v26  ;;  %v378_v21 = vmul.f32 0.03125, %v334_v11 }
 0x119   :  { %v677_v13 = vsub.f32 1.5, %v676_v31  ;;  %v1734_v7 = vadd.f32 1e-05, %v385_v16  ;;  %v426_v16 = vmul.f32 0.5, %v425_v18 }
 0x11a   :  { %v1700_v43 = vpop.eup %1159  ;;  %v597_v46 = vsub.f32 1.5, %v596_v38  ;;  %v1706_v25 = vadd.f32 1e-05, %v377_v37  ;;  %v1711_v26 = vadd.f32 1e-05, %v378_v21 }
 0x11b   :  { %v1704_v23 = vpop.eup %1161  ;;  %v434_v37 = vmul.f32 %v1700_v43, %v1683_v15  ;;  %vm440_vm2 = vweird.f32 %v1700_v43 }
 0x11c   :  { %v1708_v62 = vpop.eup %1163  ;;  %v598_v10 = vmul.f32 %v1156_v24, %v597_v46  ;;  %v514_v9 = vmul.f32 %v1704_v23, %v1687_v52  ;;  %v592_v46 = vsel %vm1713_vm4, %v1662_v4, %v588_v30  ;;  %1165 = vrsqrt.f32 %v1706_v25  ;;  %vm1844_vm6 = vmor %vm439_vm15, %vm440_vm2 }
 0x11d   :  { %v504_v27 = vmul.f32 %v1708_v62, %v1689_v53  ;;  %1167 = vrsqrt.f32 %v1711_v26  ;;  %v759_v11 = vmul.f32 %v592_v46, %v1467_v44  ;;  %v435_v63 = vmul.f32 %v1700_v43, %v434_v37 }
 0x11e   :  { %v302_v31 = vpop.xlane.xlu0 %301  ;;  %v602_v4 = vsel %vm1728_vm7, %v1156_v24, %v598_v10  ;;  %v515_v17 = vmul.f32 %v1704_v23, %v514_v9  ;;  %1169 = vrsqrt.f32 %v1734_v7  ;;  %vm520_vm3 = vweird.f32 %v1704_v23 }
 0x11f   :  { %v350_v38 = vpop.xlane.xlu1 %349  ;;  %v300_v21 = vpop.xlane.xlu2 %299  ;;  %v362_v14 = vmul.f32 0.03125, %v302_v31  ;;  %v505_v44 = vmul.f32 %v1708_v62, %v504_v27  ;;  %vm510_vm4 = vweird.f32 %v1708_v62  ;;  %vm521_vm10 = vmor %vm519_vm1, %vm520_vm3  ;;  %vm619_vm11 = vweird.f32 %v1711_v26 }
 0x120   :  { %v361_v28 = vmul.f32 0.03125, %v300_v21  ;;  %v386_v6 = vmul.f32 0.03125, %v350_v38  ;;  %v760_v21 = vmul.f32 %v602_v4, %v1486_v59  ;;  %v672_v59 = vsel %vm1750_vm9, %v1668_v20, %v668_v61  ;;  %vm1856_vm8 = vmor %vm509_vm0, %vm510_vm4 }
 0x121   :  { %v1757_v24 = vadd.f32 1e-05, %v362_v14  ;;  %v1774_v14 = vld [vmem:[%s2418_s2] ss:$0 sm:$0xff]  ;;  %v427_v20 = vsub.f32 1.5, %v426_v16  ;;  %v436_v61 = vmul.f32 0.5, %v435_v63  ;;  %v767_v22 = vmul.f32 %v672_v59, %v1470_v45 }
 0x122   :  { %v1740_v30 = vadd.f32 1e-05, %v361_v28  ;;  %v678_v28 = vmul.f32 %v1680_v40, %v677_v13  ;;  %v1761_v10 = vadd.f32 1e-05, %v386_v6  ;;  %v1766_v18 = vpop.eup %1165  ;;  %v795_v13 = vmul.f32 %v1743_v3, %v759_v11 }
 0x123   :  { %v1776_v9 = vpop.eup %1167  ;;  %v796_v37 = vmul.f32 %v1743_v3, %v760_v21  ;;  %v506_v12 = vmul.f32 0.5, %v505_v44  ;;  %v516_v31 = vmul.f32 0.5, %v515_v17  ;;  %v604_v4 = vmul.f32 %v1766_v18, %v1706_v25 }
 0x124   :  { %1171 = vrsqrt.f32 %v1740_v30  ;;  %v682_v46 = vsel %vm1778_vm12, %v1680_v40, %v678_v28  ;;  %v614_v16 = vmul.f32 %v1776_v9, %v1711_v26  ;;  %v831_v21 = vadd.f32 %v1774_v14, %v795_v13  ;;  %v1798_v45 = vpop.eup %1169 }
 0x125   :  { %1173 = vrsqrt.f32 %v1757_v24  ;;  %v832_v63 = vadd.f32 %v1774_v14, %v796_v37  ;;  %v768_v40 = vmul.f32 %v682_v46, %v1483_v58  ;;  %v437_v38 = vsub.f32 1.5, %v436_v61 }
 0x126   :  { %1175 = vrsqrt.f32 %v1761_v10  ;;  %v336_v11 = vpop.xlane.xlu0 %335  ;;  %v507_v17 = vsub.f32 1.5, %v506_v12  ;;  %v803_v6 = vmul.f32 %v1743_v3, %v767_v22  ;;  %v428_v58 = vmul.f32 %v1694_v60, %v427_v20 }
 0x127   :  { %v316_v27 = vpop.xlane.xlu1 %315  ;;  %v855_v59 = vpack.c.bf16 %v832_v63, %v831_v21  ;;  %v379_v37 = vmul.f32 0.03125, %v336_v11  ;;  %v318_v13 = vpop.xlane.xlu2 %317  ;;  %v517_v46 = vsub.f32 1.5, %v516_v31  ;;  %v605_v61 = vmul.f32 %v1766_v18, %v604_v4 }
 0x128   :  { %v369_v28 = vmul.f32 0.03125, %v316_v27  ;;  %v684_v27 = vmul.f32 %v1798_v45, %v1734_v7  ;;  %v615_v12 = vmul.f32 %v1776_v9, %v614_v16  ;;  %v804_v22 = vmul.f32 %v1743_v3, %v768_v40 }
 0x129   :  { %979 = vmatmul.bf16.vlgmr.msra.gmra.mxu2 %v855_v59  ;;  %v438_v20 = vmul.f32 %v1700_v43, %v437_v38  ;;  %v508_v11 = vmul.f32 %v1708_v62, %v507_v17  ;;  %v839_v21 = vadd.f32 %v1774_v14, %v803_v6  ;;  %v1827_v59 = vadd.f32 1e-05, %v379_v37 }
 0x12a   :  { %v1802_v44 = vpop.eup %1171  ;;  %v1822_v4 = vadd.f32 1e-05, %v369_v28  ;;  %v840_v16 = vadd.f32 %v1774_v14, %v804_v22  ;;  %v518_v38 = vmul.f32 %v1704_v23, %v517_v46  ;;  %v606_v28 = vmul.f32 0.5, %v605_v61 }
 0x12b   :  { %v1809_v19 = vpop.eup %1173  ;;  %v444_v31 = vmul.f32 %v1802_v44, %v1740_v30  ;;  %v370_v48 = vmul.f32 0.03125, %v318_v13  ;;  %v685_v29 = vmul.f32 %v1798_v45, %v684_v27  ;;  %vm610_vm7 = vweird.f32 %v1766_v18 }
 0x12c   :  { %v1816_v63 = vpop.eup %1175  ;;  %v454_v17 = vmul.f32 %v1809_v19, %v1757_v24  ;;  %v616_v37 = vmul.f32 0.5, %v615_v12  ;;  %v859_v61 = vpack.c.bf16 %v840_v16, %v839_v21  ;;  %1177 = vrsqrt.f32 %v1822_v4 }
 0x12d   :  { %v694_v46 = vmul.f32 %v1816_v63, %v1761_v10  ;;  %v445_v15 = vmul.f32 %v1802_v44, %v444_v31  ;;  %v1862_v27 = vadd.f32 1e-05, %v370_v48  ;;  %v432_v12 = vsel %vm1833_vm5, %v1694_v60, %v428_v58 }
 0x12e   :  { %v354_v22 = vpop.xlane.xlu0 %353  ;;  %vm609_vm9 = vweird.f32 %v1706_v25  ;;  %999 = vmatmul.bf16.vlgmr.msra.gmra.mxu3 %v859_v61  ;;  %1179 = vrsqrt.f32 %v1827_v59  ;;  %v442_v53 = vsel %vm1844_vm6, %v1700_v43, %v438_v20  ;;  %v743_v31 = vmul.f32 %v432_v12, %v1480_v57 }
 0x12f   :  { %v512_v48 = vsel %vm1856_vm8, %v1708_v62, %v508_v11  ;;  %v607_v60 = vsub.f32 1.5, %v606_v28  ;;  %v455_v58 = vmul.f32 %v1809_v19, %v454_v17  ;;  %1181 = vrsqrt.f32 %v1862_v27  ;;  %v338_v20 = vpop.xlane.xlu1 %337  ;;  %v352_v16 = vpop.xlane.xlu2 %351  ;;  %vm1917_vm14 = vmor %vm609_vm9, %vm610_vm7 }
 0x130   :  { %v744_v43 = vmul.f32 %v442_v53, %v1498_v34  ;;  %v779_v57 = vmul.f32 %v1743_v3, %v743_v31  ;;  %v522_v21 = vsel %vm521_vm10, %v1704_v23, %v518_v38  ;;  %v751_v62 = vmul.f32 %v512_v48, %v1501_v35 }
 0x131   :  { %v388_v11 = vmul.f32 0.03125, %v354_v22  ;;  %v617_v52 = vsub.f32 1.5, %v616_v37  ;;  %v446_v40 = vmul.f32 0.5, %v445_v15  ;;  %v752_v6 = vmul.f32 %v522_v21, %v1504_v36 }
 0x132   :  { %v780_v28 = vmul.f32 %v1743_v3, %v744_v43  ;;  %vm620_vm12 = vweird.f32 %v1776_v9  ;;  %v787_v17 = vmul.f32 %v1743_v3, %v751_v62  ;;  %v380_v61 = vmul.f32 0.03125, %v338_v20  ;;  %v1893_v13 = vpop.eup %1177 }
 0x133   :  { %v1891_v34 = vadd.f32 1e-05, %v388_v11  ;;  %v456_v23 = vmul.f32 0.5, %v455_v58  ;;  %v695_v35 = vmul.f32 %v1816_v63, %v694_v46  ;;  %vm449_vm13 = vweird.f32 %v1740_v30  ;;  %vm1929_vm2 = vmor %vm619_vm11, %vm620_vm12 }
 0x134   :  { %v815_v38 = vadd.f32 %v1774_v14, %v779_v57  ;;  %v816_v37 = vadd.f32 %v1774_v14, %v780_v28  ;;  %v1899_v15 = vpop.eup %1179  ;;  %v686_v36 = vmul.f32 0.5, %v685_v29  ;;  %v608_v12 = vmul.f32 %v1766_v18, %v607_v60 }
 0x135   :  { %v788_v22 = vmul.f32 %v1743_v3, %v752_v6  ;;  %v823_v53 = vadd.f32 %v1774_v14, %v787_v17  ;;  %v1904_v31 = vpop.eup %1181  ;;  %v618_v48 = vmul.f32 %v1776_v9, %v617_v52  ;;  %v447_v46 = vsub.f32 1.5, %v446_v40 }
 0x136   :  { %v847_v58 = vpack.c.bf16 %v816_v37, %v815_v38  ;;  %v1907_v43 = vadd.f32 1e-05, %v380_v61  ;;  %v524_v20 = vmul.f32 %v1893_v13, %v1822_v4  ;;  %1183 = vrsqrt.f32 %v1891_v34  ;;  %v320_v28 = vpop.xlane.xlu0 %319 }
 0x137   :  { %v824_v57 = vadd.f32 %v1774_v14, %v788_v22  ;;  %v387_v29 = vmul.f32 0.03125, %v352_v16  ;;  %v457_v21 = vsub.f32 1.5, %v456_v23  ;;  %vm459_vm15 = vweird.f32 %v1757_v24  ;;  %v304_v23 = vpop.xlane.xlu1 %303  ;;  %v306_v37 = vpop.xlane.xlu2 %305 }
 0x138   :  { %v696_v62 = vmul.f32 0.5, %v695_v35  ;;  %vm450_vm0 = vweird.f32 %v1802_v44  ;;  %939 = vmatmul.bf16.vlgmr.msra.gmra.mxu0 %v847_v58  ;;  %1185 = vrsqrt.f32 %v1907_v43  ;;  %vm690_vm1 = vweird.f32 %v1798_v45 }
 0x139   :  { %v624_v11 = vmul.f32 %v1899_v15, %v1827_v59  ;;  %v851_v16 = vpack.c.bf16 %v824_v57, %v823_v53  ;;  %v1935_v52 = vadd.f32 1e-05, %v387_v29  ;;  %v612_v40 = vsel %vm1917_vm14, %v1766_v18, %v608_v12  ;;  %vm1961_vm6 = vmor %vm449_vm13, %vm450_vm0 }
 0x13a   :  { %v448_v6 = vmul.f32 %v1802_v44, %v447_v46  ;;  %v534_v26 = vmul.f32 %v1904_v31, %v1862_v27  ;;  %v622_v17 = vsel %vm1929_vm2, %v1776_v9, %v618_v48  ;;  %v761_v61 = vmul.f32 %v612_v40, %v1516_v49 }
 0x13b   :  { %v687_v35 = vsub.f32 1.5, %v686_v36  ;;  %vm689_vm3 = vweird.f32 %v1734_v7  ;;  %v525_v38 = vmul.f32 %v1893_v13, %v524_v20  ;;  %959 = vmatmul.bf16.vlgmr.msra.gmra.mxu1 %v851_v16  ;;  %1187 = vrsqrt.f32 %v1935_v52 }
 0x13c   :  { %v762_v18 = vmul.f32 %v622_v17, %v1519_v50  ;;  %v458_v12 = vmul.f32 %v1809_v19, %v457_v21  ;;  %vm460_vm4 = vweird.f32 %v1809_v19  ;;  %v697_v22 = vsub.f32 1.5, %v696_v62  ;;  %v1955_v9 = vpop.eup %1183  ;;  %vm691_vm11 = vmor %vm689_vm3, %vm690_vm1 }
 0x13d   :  { %vm699_vm5 = vweird.f32 %v1761_v10  ;;  %v797_v49 = vmul.f32 %v1743_v3, %v761_v61  ;;  %v625_v50 = vmul.f32 %v1899_v15, %v624_v11  ;;  %v371_v48 = vmul.f32 0.03125, %v320_v28  ;;  %vm1991_vm8 = vmor %vm459_vm15, %vm460_vm4 }
 0x13e   :  { %v798_v53 = vmul.f32 %v1743_v3, %v762_v18  ;;  %v363_v46 = vmul.f32 0.03125, %v304_v23  ;;  %v1967_v58 = vpop.eup %1185  ;;  %v535_v20 = vmul.f32 %v1904_v31, %v534_v26  ;;  %v364_v29 = vmul.f32 0.03125, %v306_v37 }
 0x13f   :  { %v833_v57 = vadd.f32 %v1774_v14, %v797_v49  ;;  %v452_v30 = vsel %vm1961_vm6, %v1802_v44, %v448_v6  ;;  %v688_v60 = vmul.f32 %v1798_v45, %v687_v35  ;;  %vm700_vm7 = vweird.f32 %v1816_v63 }
 0x140   :  { %v526_v21 = vmul.f32 0.5, %v525_v38  ;;  %v834_v62 = vadd.f32 %v1774_v14, %v798_v53  ;;  %v714_v25 = vmul.f32 %v1955_v9, %v1891_v34  ;;  %v634_v11 = vmul.f32 %v1967_v58, %v1907_v43  ;;  %vm701_vm13 = vmor %vm699_vm5, %vm700_vm7 }
 0x141   :  { %v1981_v16 = vadd.f32 1e-05, %v371_v48  ;;  %v1983_v40 = vadd.f32 1e-05, %v363_v46  ;;  %v1985_v28 = vpop.eup %1187  ;;  %v626_v6 = vmul.f32 0.5, %v625_v50  ;;  %v745_v61 = vmul.f32 %v452_v30, %v1537_v1  ;;  %v342_v1 = vpop.xlane.xlu0 %341 }
 0x142   :  { %v856_v26 = vpack.c.bf16 %v834_v62, %v833_v57  ;;  %v1995_v17 = vadd.f32 1e-05, %v364_v29  ;;  %v698_v23 = vmul.f32 %v1816_v63, %v697_v22  ;;  %v536_v35 = vmul.f32 0.5, %v535_v20  ;;  %v340_v30 = vpop.xlane.xlu2 %339 }
 0x143   :  { %1189 = vrsqrt.f32 %v1981_v16  ;;  %v462_v38 = vsel %vm1991_vm8, %v1809_v19, %v458_v12  ;;  %vm529_vm9 = vweird.f32 %v1822_v4  ;;  %vm530_vm10 = vweird.f32 %v1893_v13  ;;  %v322_v12 = vpop.xlane.xlu1 %321 }
 0x144   :  { %v704_v24 = vmul.f32 %v1985_v28, %v1935_v52  ;;  %984 = vmatmul.bf16.gmra.mxu2 %v856_v26  ;;  %1191 = vrsqrt.f32 %v1983_v40  ;;  %v527_v18 = vsub.f32 1.5, %v526_v21  ;;  %vm539_vm12 = vweird.f32 %v1862_v27  ;;  %vm2059_vm2 = vmor %vm529_vm9, %vm530_vm10 }
 0x145   :  { %v715_v19 = vmul.f32 %v1955_v9, %v714_v25  ;;  %v635_v37 = vmul.f32 %v1967_v58, %v634_v11  ;;  %1193 = vrsqrt.f32 %v1995_v17  ;;  %v627_v22 = vsub.f32 1.5, %v626_v6 }
 0x146   :  { %v746_v49 = vmul.f32 %v462_v38, %v1540_v2  ;;  %v781_v7 = vmul.f32 %v1743_v3, %v745_v61  ;;  %v692_v36 = vsel %vm691_vm11, %v1798_v45, %v688_v60  ;;  %v537_v50 = vsub.f32 1.5, %v536_v35 }
 0x147   :  { %v702_v53 = vsel %vm701_vm13, %v1816_v63, %v698_v23  ;;  %v769_v48 = vmul.f32 %v692_v36, %v1522_v51  ;;  %v382_v46 = vmul.f32 0.03125, %v342_v1  ;;  %v705_v20 = vmul.f32 %v1985_v28, %v704_v24 }
 0x148   :  { %v782_v57 = vmul.f32 %v1743_v3, %v746_v49  ;;  %v817_v10 = vadd.f32 %v1774_v14, %v781_v7  ;;  %v770_v29 = vmul.f32 %v702_v53, %v1534_v0  ;;  %vm630_vm14 = vweird.f32 %v1899_v15 }
 0x149   :  { %v2029_v2 = vpop.eup %1189  ;;  %v716_v45 = vmul.f32 0.5, %v715_v19  ;;  %v636_v60 = vmul.f32 0.5, %v635_v37  ;;  %v805_v63 = vmul.f32 %v1743_v3, %v769_v48  ;;  %v2033_v21 = vadd.f32 1e-05, %v382_v46  ;;  %v308_v46 = vpop.xlane.xlu0 %307 }
 0x14a   :  { %v2035_v51 = vpop.eup %1191  ;;  %v544_v62 = vmul.f32 %v2029_v2, %v1981_v16  ;;  %v818_v25 = vadd.f32 %v1774_v14, %v782_v57  ;;  %v806_v0 = vmul.f32 %v1743_v3, %v770_v29  ;;  %v372_v11 = vmul.f32 0.03125, %v322_v12 }
 0x14b   :  { %v2041_v44 = vpop.eup %1193  ;;  %vm629_vm15 = vweird.f32 %v1827_v59  ;;  %v528_v6 = vmul.f32 %v1893_v13, %v527_v18  ;;  %v538_v26 = vmul.f32 %v1904_v31, %v537_v50  ;;  %vm540_vm0 = vweird.f32 %v1904_v31  ;;  %v356_v48 = vpop.xlane.xlu1 %355 }
 0x14c   :  { %v464_v61 = vmul.f32 %v2035_v51, %v1983_v40  ;;  %v2050_v23 = vmul.f32 %v1899_v15, %v627_v22  ;;  %vm639_vm1 = vweird.f32 %v1907_v43  ;;  %v706_v35 = vmul.f32 0.5, %v705_v20  ;;  %vm2068_vm3 = vmor %vm539_vm12, %vm540_vm0 }
 0x14d   :  { %v474_v38 = vmul.f32 %v2041_v44, %v1995_v17  ;;  %v848_v24 = vpack.c.bf16 %v818_v25, %v817_v10  ;;  %v717_v18 = vsub.f32 1.5, %v716_v45  ;;  %v841_v19 = vadd.f32 %v1774_v14, %v805_v63  ;;  %v358_v63 = vpop.xlane.xlu2 %357  ;;  %vm2105_vm9 = vmor %vm629_vm15, %vm630_vm14 }
 0x14e   :  { %v842_v37 = vadd.f32 %v1774_v14, %v806_v0  ;;  %1195 = vrsqrt.f32 %v2033_v21  ;;  %v637_v22 = vsub.f32 1.5, %v636_v60  ;;  %v545_v4 = vmul.f32 %v2029_v2, %v544_v62 }
 0x14f   :  { %944 = vmatmul.bf16.gmra.mxu0 %v848_v24  ;;  %v2073_v49 = vadd.f32 1e-05, %v372_v11  ;;  %v381_v7 = vmul.f32 0.03125, %v340_v30  ;;  %v465_v36 = vmul.f32 %v2035_v51, %v464_v61  ;;  %v532_v53 = vsel %vm2059_vm2, %v1893_v13, %v528_v6 }
 0x150   :  { %v860_v50 = vpack.c.bf16 %v842_v37, %v841_v19  ;;  %v542_v27 = vsel %vm2068_vm3, %v1904_v31, %v538_v26  ;;  %vm720_vm4 = vweird.f32 %v1955_v9  ;;  %vm640_vm5 = vweird.f32 %v1967_v58 }
 0x151   :  { %v707_v20 = vsub.f32 1.5, %v706_v35  ;;  %vm709_vm6 = vweird.f32 %v1935_v52  ;;  %v475_v57 = vmul.f32 %v2041_v44, %v474_v38  ;;  %1197 = vrsqrt.f32 %v2073_v49  ;;  %vm2117_vm10 = vmor %vm639_vm1, %vm640_vm5 }
 0x152   :  { %vm710_vm7 = vweird.f32 %v1985_v28  ;;  %1004 = vmatmul.bf16.gmra.mxu3 %v860_v50  ;;  %v2088_v13 = vadd.f32 1e-05, %v381_v7  ;;  %v753_v31 = vmul.f32 %v532_v53, %v1552_v39  ;;  %v754_v10 = vmul.f32 %v542_v27, %v1555_v41 }
 0x153   :  { %v2093_v29 = vmul.f32 %v1955_v9, %v717_v18  ;;  %vm719_vm8 = vweird.f32 %v1891_v34  ;;  %v638_v30 = vmul.f32 %v1967_v58, %v637_v22  ;;  %v389_v45 = vmul.f32 0.03125, %v356_v48  ;;  %vm2147_vm11 = vmor %vm709_vm6, %vm710_vm7 }
 0x154   :  { %v365_v60 = vmul.f32 0.03125, %v308_v46  ;;  %v2097_v62 = vpop.eup %1195  ;;  %v546_v25 = vmul.f32 0.5, %v545_v4  ;;  %v466_v0 = vmul.f32 0.5, %v465_v36  ;;  %1199 = vrsqrt.f32 %v2088_v13  ;;  %vm2168_vm15 = vmor %vm719_vm8, %vm720_vm4 }
 0x155   :  { %v789_v39 = vmul.f32 %v1743_v3, %v753_v31  ;;  %v708_v11 = vmul.f32 %v1985_v28, %v707_v20  ;;  %v476_v6 = vmul.f32 0.5, %v475_v57  ;;  %v654_v26 = vmul.f32 %v2097_v62, %v2033_v21 }
 0x156   :  { %v790_v61 = vmul.f32 %v1743_v3, %v754_v10  ;;  %v2122_v38 = vadd.f32 1e-05, %v389_v45  ;;  %v2124_v24 = vadd.f32 1e-05, %v365_v60  ;;  %v390_v1 = vmul.f32 0.03125, %v358_v63 }
 0x157   :  { %v825_v59 = vadd.f32 %v1774_v14, %v789_v39  ;;  %v2126_v18 = vpop.eup %1197  ;;  %v655_v19 = vmul.f32 %v2097_v62, %v654_v26  ;;  %v632_v43 = vsel %vm2105_vm9, %v1899_v15, %v2050_v23  ;;  %v642_v12 = vsel %vm2117_vm10, %v1967_v58, %v638_v30  ;;  %v326_v26 = vpop.xlane.xlu0 %325 }
 0x158   :  { %v826_v37 = vadd.f32 %v1774_v14, %v790_v61  ;;  %v547_v22 = vsub.f32 1.5, %v546_v25  ;;  %v467_v4 = vsub.f32 1.5, %v466_v0  ;;  %v554_v7 = vmul.f32 %v2126_v18, %v2073_v49 }
 0x159   :  { %1201 = vrsqrt.f32 %v2122_v38  ;;  %v477_v36 = vsub.f32 1.5, %v476_v6  ;;  %v656_v50 = vmul.f32 0.5, %v655_v19  ;;  %v2152_v23 = vadd.f32 1e-05, %v390_v1  ;;  %v310_v6 = vpop.xlane.xlu1 %309 }
 0x15a   :  { %v852_v53 = vpack.c.bf16 %v826_v37, %v825_v59  ;;  %1203 = vrsqrt.f32 %v2124_v24  ;;  %v2141_v27 = vpop.eup %1199  ;;  %v555_v58 = vmul.f32 %v2126_v18, %v554_v7  ;;  %v763_v48 = vmul.f32 %v632_v43, %v1558_v42 }
 0x15b   :  { %v764_v46 = vmul.f32 %v642_v12, %v1570_v54  ;;  %vm550_vm12 = vweird.f32 %v2029_v2  ;;  %vm469_vm13 = vweird.f32 %v1983_v40  ;;  %vm470_vm14 = vweird.f32 %v2035_v51 }
 0x15c   :  { %v644_v52 = vmul.f32 %v2141_v27, %v2088_v13  ;;  %964 = vmatmul.bf16.gmra.mxu1 %v852_v53  ;;  %v712_v20 = vsel %vm2147_vm11, %v1985_v28, %v708_v11  ;;  %v2173_v54 = vmul.f32 %v2029_v2, %v547_v22  ;;  %v2176_v57 = vmul.f32 %v2035_v51, %v467_v4  ;;  %v324_v4 = vpop.xlane.xlu2 %323  ;;  %vm2226_vm9 = vmor %vm469_vm13, %vm470_vm14 }
 0x15d   :  { %vm480_vm0 = vweird.f32 %v2041_v44  ;;  %1205 = vrsqrt.f32 %v2152_v23  ;;  %v799_v28 = vmul.f32 %v1743_v3, %v763_v48  ;;  %vm549_vm1 = vweird.f32 %v1981_v16 }
 0x15e   :  { %v556_v31 = vmul.f32 0.5, %v555_v58  ;;  %v645_v34 = vmul.f32 %v2141_v27, %v644_v52  ;;  %v800_v10 = vmul.f32 %v1743_v3, %v764_v46  ;;  %v722_v30 = vsel %vm2168_vm15, %v1955_v9, %v2093_v29  ;;  %vm2246_vm11 = vmor %vm549_vm1, %vm550_vm12 }
 0x15f   :  { %v2188_v45 = vpop.eup %1201  ;;  %v2191_v60 = vmul.f32 %v2041_v44, %v477_v36  ;;  %vm479_vm2 = vweird.f32 %v1995_v17  ;;  %v657_v63 = vsub.f32 1.5, %v656_v50  ;;  %v771_v25 = vmul.f32 %v712_v20, %v1573_v55 }
 0x160   :  { %v772_v0 = vmul.f32 %v722_v30, %v1576_v56  ;;  %v2196_v39 = vpop.eup %1203  ;;  %vm559_vm3 = vweird.f32 %v2073_v49  ;;  %v646_v41 = vmul.f32 0.5, %v645_v34  ;;  %v724_v9 = vmul.f32 %v2188_v45, %v2122_v38  ;;  %vm481_vm15 = vmor %vm479_vm2, %vm480_vm0 }
 0x161   :  { %v835_v29 = vadd.f32 %v1774_v14, %v799_v28  ;;  %v836_v11 = vadd.f32 %v1774_v14, %v800_v10  ;;  %vm660_vm4 = vweird.f32 %v2097_v62  ;;  %vm560_vm5 = vweird.f32 %v2126_v18 }
 0x162   :  { %vm650_vm6 = vweird.f32 %v2141_v27  ;;  %v484_v55 = vmul.f32 %v2196_v39, %v2124_v24  ;;  %v807_v56 = vmul.f32 %v1743_v3, %v771_v25  ;;  %v557_v61 = vsub.f32 1.5, %v556_v31 }
 0x163   :  { %vm649_vm7 = vweird.f32 %v2088_v13  ;;  %v725_v35 = vmul.f32 %v2188_v45, %v724_v9  ;;  %v857_v59 = vpack.c.bf16 %v836_v11, %v835_v29  ;;  %v808_v1 = vmul.f32 %v1743_v3, %v772_v0  ;;  %v2212_v19 = vpop.eup %1205 }
 0x164   :  { %vm659_vm8 = vweird.f32 %v2033_v21  ;;  %v485_v37 = vmul.f32 %v2196_v39, %v484_v55  ;;  %v843_v43 = vadd.f32 %v1774_v14, %v807_v56  ;;  %v366_v12 = vmul.f32 0.03125, %v310_v6  ;;  %vm651_vm2 = vmor %vm649_vm7, %vm650_vm6 }
 0x165   :  { %v374_v22 = vmul.f32 0.03125, %v326_v26  ;;  %v2218_v7 = vmul.f32 %v2097_v62, %v657_v63  ;;  %v647_v36 = vsub.f32 1.5, %v646_v41  ;;  %v726_v50 = vmul.f32 0.5, %v725_v35  ;;  %989 = vmatmul.bf16.gmra.mxu2 %v857_v59  ;;  %v2480_v35 = vld [vmem:[#allocation12_spill] sm:$0xff] }
 0x166   :  { %v734_v53 = vmul.f32 %v2212_v19, %v2152_v23  ;;  %v486_v58 = vmul.f32 0.5, %v485_v37  ;;  %v844_v48 = vadd.f32 %v1774_v14, %v808_v1  ;;  %v2231_v46 = vadd.f32 1e-05, %v366_v12 }
 0x167   :  { %v2233_v52 = vadd.f32 1e-05, %v374_v22  ;;  %v558_v20 = vmul.f32 %v2126_v18, %v557_v61  ;;  %vm729_vm10 = vweird.f32 %v2122_v38  ;;  %v373_v28 = vmul.f32 0.03125, %v324_v4 }
 0x168   :  { %v735_v42 = vmul.f32 %v2212_v19, %v734_v53  ;;  %v472_v40 = vsel %vm2226_vm9, %v2035_v51, %v2176_v57  ;;  %v727_v34 = vsub.f32 1.5, %v726_v50  ;;  %vm730_vm13 = vweird.f32 %v2188_v45  ;;  %vm2265_vm9 = vmor %vm559_vm3, %vm560_vm5 }
 0x169   :  { %vm739_vm14 = vweird.f32 %v2152_v23  ;;  %v861_v10 = vpack.c.bf16 %v844_v48, %v843_v43  ;;  %1207 = vrsqrt.f32 %v2231_v46  ;;  %v648_v51 = vmul.f32 %v2141_v27, %v647_v36  ;;  %vm2295_vm3 = vmor %vm659_vm8, %vm660_vm4 }
 0x16a   :  { %vm490_vm12 = vweird.f32 %v2196_v39  ;;  %v736_v16 = vmul.f32 0.5, %v735_v42  ;;  %vm740_vm1 = vweird.f32 %v2212_v19  ;;  %1209 = vrsqrt.f32 %v2233_v52  ;;  %vm2318_vm4 = vmor %vm729_vm10, %vm730_vm13 }
 0x16b   :  { %v487_v30 = vsub.f32 1.5, %v486_v58  ;;  %1009 = vmatmul.bf16.gmra.mxu3 %v861_v10  ;;  %v2269_v17 = vadd.f32 1e-05, %v373_v28  ;;  %v482_v63 = vsel %vm481_vm15, %v2041_v44, %v2191_v60  ;;  %v747_v25 = vmul.f32 %v472_v40, %v1588_v32  ;;  %vm2329_vm6 = vmor %vm739_vm14, %vm740_vm1  ;;  %v2484_v40 = vld [vmem:[#allocation14_spill] sm:$0xff] }
 0x16c   :  { %vm489_vm0 = vweird.f32 %v2124_v24  ;;  %v737_v0 = vsub.f32 1.5, %v736_v16  ;;  %v748_v41 = vmul.f32 %v482_v63, %v1591_v5  ;;  %v552_v49 = vsel %vm2246_vm11, %v2029_v2, %v2173_v54  ;;  %v2485_v24 = vld [vmem:[#allocation15_spill] sm:$0xff] }
 0x16d   :  { %v562_v9 = vsel %vm2265_vm9, %v2126_v18, %v558_v20  ;;  %v728_v32 = vmul.f32 %v2188_v45, %v727_v34  ;;  %1211 = vrsqrt.f32 %v2269_v17  ;;  %v783_v5 = vmul.f32 %v1743_v3, %v747_v25  ;;  %vm491_vm8 = vmor %vm489_vm0, %vm490_vm12  ;;  %v2483_v20 = vld [vmem:[#allocation13_spill] sm:$0xff] }
 0x16e   :  { %v755_v44 = vmul.f32 %v552_v49, %v1594_v33  ;;  %v738_v18 = vmul.f32 %v2212_v19, %v737_v0  ;;  %v784_v13 = vmul.f32 %v1743_v3, %v748_v41  ;;  %v756_v54 = vmul.f32 %v562_v9, %v1606_v47 }
 0x16f   :  { %v652_v60 = vsel %vm651_vm2, %v2141_v27, %v648_v51  ;;  %v1208_v29 = vpop.eup %1207  ;;  %v819_v11 = vadd.f32 %v1774_v14, %v783_v5  ;;  %v662_v21 = vsel %vm2295_vm3, %v2097_v62, %v2218_v7  ;;  %v488_v55 = vmul.f32 %v2196_v39, %v487_v30 }
 0x170   :  { %v791_v33 = vmul.f32 %v1743_v3, %v755_v44  ;;  %v765_v6 = vmul.f32 %v652_v60, %v1609_v8  ;;  %v1210_v26 = vpop.eup %1209  ;;  %v494_v56 = vmul.f32 %v1208_v29, %v2231_v46  ;;  %v820_v47 = vadd.f32 %v1774_v14, %v784_v13 }
 0x171   :  { %v792_v27 = vmul.f32 %v1743_v3, %v756_v54  ;;  %vm500_vm5 = vweird.f32 %v1208_v29  ;;  %v574_v8 = vmul.f32 %v1210_v26, %v2233_v52  ;;  %v766_v59 = vmul.f32 %v662_v21, %v2480_v35  ;;  %v2488_v21 = vld [vmem:[#allocation16_spill] sm:$0xff] }
 0x172   :  { %v827_v62 = vadd.f32 %v1774_v14, %v791_v33  ;;  %v495_v38 = vmul.f32 %v1208_v29, %v494_v56  ;;  %v849_v37 = vpack.c.bf16 %v820_v47, %v819_v11  ;;  %v801_v12 = vmul.f32 %v1743_v3, %v765_v6 }
 0x173   :  { %v828_v43 = vadd.f32 %v1774_v14, %v792_v27  ;;  %v1212_v22 = vpop.eup %1211  ;;  %v575_v4 = vmul.f32 %v1210_v26, %v574_v8  ;;  %v802_v7 = vmul.f32 %v1743_v3, %v766_v59  ;;  %v732_v36 = vsel %vm2318_vm4, %v2188_v45, %v728_v32  ;;  %v2376_v27 = vld [vmem:[%s2420_s4] ss:$0 sm:$0xff]  ;;  %s1323_s4 = smov [#allocation8]  }
 0x174   :  { %v742_v23 = vsel %vm2329_vm6, %v2212_v19, %v738_v18  ;;  %v496_v50 = vmul.f32 0.5, %v495_v38  ;;  %vm580_vm7 = vweird.f32 %v1210_v26  ;;  %v564_v53 = vmul.f32 %v1212_v22, %v2269_v17  ;;  %949 = vmatmul.bf16.gmra.mxu0 %v849_v37  ;;  %s1056_s12 = sshll.u32 %s1323_s4, 4  ;;  %s1057_s12 = int_to_ptr.vmem [resolvable:$true] %s1056_s12 }
 0x175   :  { %v853_v15 = vpack.c.bf16 %v828_v43, %v827_v62  ;;  %v576_v58 = vmul.f32 0.5, %v575_v4  ;;  %v837_v48 = vadd.f32 %v1774_v14, %v801_v12  ;;  %v838_v45 = vadd.f32 %v1774_v14, %v802_v7 }
 0x176   :  { %v773_v42 = vmul.f32 %v732_v36, %v2483_v20  ;;  %v497_v28 = vsub.f32 1.5, %v496_v50  ;;  %v565_v19 = vmul.f32 %v1212_v22, %v564_v53  ;;  %v774_v31 = vmul.f32 %v742_v23, %v2484_v40 }
 0x177   :  { %969 = vmatmul.bf16.gmra.mxu1 %v853_v15  ;;  %v492_v34 = vsel %vm491_vm8, %v2196_v39, %v488_v55  ;;  %v577_v10 = vsub.f32 1.5, %v576_v58  ;;  %v858_v51 = vpack.c.bf16 %v838_v45, %v837_v48  ;;  %vm499_vm10 = vweird.f32 %v2231_v46  ;;  %v2486_v46 = vld [vmem:[#allocation17_spill] sm:$0xff] }
 0x178   :  { %v809_v16 = vmul.f32 %v1743_v3, %v773_v42  ;;  %v749_v57 = vmul.f32 %v492_v34, %v2485_v24  ;;  %v498_v30 = vmul.f32 %v1208_v29, %v497_v28  ;;  %v566_v63 = vmul.f32 0.5, %v565_v19  ;;  %vm501_vm11 = vmor %vm499_vm10, %vm500_vm5 }
 0x179   :  { %v810_v25 = vmul.f32 %v1743_v3, %v774_v31  ;;  %v578_v0 = vmul.f32 %v1210_v26, %v577_v10  ;;  %vm579_vm13 = vweird.f32 %v2233_v52  ;;  %994 = vmatmul.bf16.gmra.mxu2 %v858_v51  ;;  %vm570_vm15 = vweird.f32 %v1212_v22  ;;  %v2487_v52 = vld [vmem:[#allocation18_spill] sm:$0xff] }
 0x17a   :  { %v845_v39 = vadd.f32 %v1774_v14, %v809_v16  ;;  %v502_v41 = vsel %vm501_vm11, %v1208_v29, %v498_v30  ;;  %vm581_vm14 = vmor %vm579_vm13, %vm580_vm7  ;;  %v567_v49 = vsub.f32 1.5, %v566_v63  ;;  %v785_v44 = vmul.f32 %v1743_v3, %v749_v57 }
 0x17b   :  { %v846_v9 = vadd.f32 %v1774_v14, %v810_v25  ;;  %v582_v32 = vsel %vm581_vm14, %v1210_v26, %v578_v0  ;;  %v750_v5 = vmul.f32 %v502_v41, %v2486_v46  ;;  %vm569_vm12 = vweird.f32 %v2269_v17 }
 0x17c   :  { %v568_v2 = vmul.f32 %v1212_v22, %v567_v49  ;;  %v758_v13 = vmul.f32 %v582_v32, %v2487_v52  ;;  %vm571_vm1 = vmor %vm569_vm12, %vm570_vm15  ;;  %v821_v11 = vadd.f32 %v1774_v14, %v785_v44 }
 0x17d   :  { %v862_v18 = vpack.c.bf16 %v846_v9, %v845_v39  ;;  %v786_v54 = vmul.f32 %v1743_v3, %v750_v5 }
 0x17e   :  { %v572_v60 = vsel %vm571_vm1, %v1212_v22, %v568_v2  ;;  %v794_v29 = vmul.f32 %v1743_v3, %v758_v13 }
 0x17f   :  { %1014 = vmatmul.bf16.gmra.mxu3 %v862_v18  ;;  %v822_v33 = vadd.f32 %v1774_v14, %v786_v54  ;;  %v757_v6 = vmul.f32 %v572_v60, %v2488_v21 }
 0x180   :  { %v830_v17 = vadd.f32 %v1774_v14, %v794_v29 }
 0x181   :  { %v850_v26 = vpack.c.bf16 %v822_v33, %v821_v11  ;;  %v793_v55 = vmul.f32 %v1743_v3, %v757_v6 }
 0x183   :  { %v829_v56 = vadd.f32 %v1774_v14, %v793_v55 }
 0x184   :  { %954 = vmatmul.bf16.gmra.mxu0 %v850_v26 }
 0x185   :  { %v854_v47 = vpack.c.bf16 %v830_v17, %v829_v56 }
 0x187   :  { %974 = vmatmul.bf16.gmra.mxu1 %v854_v47 }
 0x1ac   :  { %v980_v61 = vpop.f32.mrf.mxu2 }
 0x1ad   :  { %v981_v8 = vadd.f32 %v2376_v27, %v980_v61 }
 0x1af   :  { %1036 = vst [vmem:[#allocation8 + $0x80] sm:$0xff] %v981_v8 }
 0x1b1   :  { %v1000_v62 = vpop.f32.mrf.mxu3 }
 0x1b2   :  { %v1001_v35 = vadd.f32 %v2376_v27, %v1000_v62 }
 0x1b4   :  { %v982_v3 = vpop.f32.mrf.mxu2  ;;  %1044 = vst [vmem:[#allocation8 + $0xc0] sm:$0xff] %v1001_v35 }
 0x1b5   :  { %v940_v59 = vpop.f32.mrf.mxu0  ;;  %v983_v14 = vadd.f32 %v2376_v27, %v982_v3 }
 0x1b6   :  { %v941_v1 = vadd.f32 %v2376_v27, %v940_v59 }
 0x1b7   :  { %1037 = vst [vmem:[#allocation8 + $0x88] sm:$0xff] %v983_v14 }
 0x1b8   :  { %1020 = vst [vmem:[#allocation8] sm:$0xff] %v941_v1  ;;  %v960_v38 = vpop.f32.mrf.mxu1 }
 0x1b9   :  { %v961_v37 = vadd.f32 %v2376_v27, %v960_v38  ;;  %v1002_v43 = vpop.f32.mrf.mxu3 }
 0x1ba   :  { %v1003_v12 = vadd.f32 %v2376_v27, %v1002_v43 }
 0x1bb   :  { %1028 = vst [vmem:[#allocation8 + $0x40] sm:$0xff] %v961_v37 }
 0x1bc   :  { %1045 = vst [vmem:[#allocation8 + $0xc8] sm:$0xff] %v1003_v12 }
 0x1bd   :  { %v942_v22 = vpop.f32.mrf.mxu0 }
 0x1be   :  { %v943_v4 = vadd.f32 %v2376_v27, %v942_v22 }
 0x1c0   :  { %1021 = vst [vmem:[#allocation8 + $0x8] sm:$0xff] %v943_v4  ;;  %v962_v7 = vpop.f32.mrf.mxu1 }
 0x1c1   :  { %v963_v36 = vadd.f32 %v2376_v27, %v962_v7 }
 0x1c3   :  { %1029 = vst [vmem:[#allocation8 + $0x48] sm:$0xff] %v963_v36 }
 0x1c7   :  { %v985_v23 = vpop.f32.mrf.mxu2 }
 0x1c8   :  { %v986_v50 = vadd.f32 %v2376_v27, %v985_v23 }
 0x1ca   :  { %1038 = vst [vmem:[#allocation8 + $0x90] sm:$0xff] %v986_v50 }
 0x1cc   :  { %v945_v53 = vpop.f32.mrf.mxu0 }
 0x1cd   :  { %v946_v15 = vadd.f32 %v2376_v27, %v945_v53 }
 0x1cf   :  { %1022 = vst [vmem:[#allocation8 + $0x10] sm:$0xff] %v946_v15  ;;  %v987_v58 = vpop.f32.mrf.mxu2 }
 0x1d0   :  { %v988_v48 = vadd.f32 %v2376_v27, %v987_v58 }
 0x1d2   :  { %1039 = vst [vmem:[#allocation8 + $0x98] sm:$0xff] %v988_v48 }
 0x1d4   :  { %v947_v45 = vpop.f32.mrf.mxu0 }
 0x1d5   :  { %v1005_v20 = vpop.f32.mrf.mxu3  ;;  %v948_v42 = vadd.f32 %v2376_v27, %v947_v45 }
 0x1d6   :  { %v1006_v28 = vadd.f32 %v2376_v27, %v1005_v20 }
 0x1d7   :  { %1023 = vst [vmem:[#allocation8 + $0x18] sm:$0xff] %v948_v42 }
 0x1d8   :  { %1046 = vst [vmem:[#allocation8 + $0xd0] sm:$0xff] %v1006_v28 }
 0x1d9   :  { %v965_v19 = vpop.f32.mrf.mxu1 }
 0x1da   :  { %v966_v40 = vadd.f32 %v2376_v27, %v965_v19 }
 0x1dc   :  { %1030 = vst [vmem:[#allocation8 + $0x50] sm:$0xff] %v966_v40 }
 0x1dd   :  { %v1007_v31 = vpop.f32.mrf.mxu3 }
 0x1de   :  { %v1008_v34 = vadd.f32 %v2376_v27, %v1007_v31 }
 0x1e0   :  { %1047 = vst [vmem:[#allocation8 + $0xd8] sm:$0xff] %v1008_v34 }
 0x1e1   :  { %v967_v10 = vpop.f32.mrf.mxu1 }
 0x1e2   :  { %v968_v51 = vadd.f32 %v2376_v27, %v967_v10 }
 0x1e4   :  { %1031 = vst [vmem:[#allocation8 + $0x58] sm:$0xff] %v968_v51 }
 0x1e8   :  { %v990_v16 = vpop.f32.mrf.mxu2 }
 0x1e9   :  { %v991_v24 = vadd.f32 %v2376_v27, %v990_v16 }
 0x1eb   :  { %1040 = vst [vmem:[#allocation8 + $0xa0] sm:$0xff] %v991_v24 }
 0x1ee   :  { %v1010_v57 = vpop.f32.mrf.mxu3 }
 0x1ef   :  { %v1011_v30 = vadd.f32 %v2376_v27, %v1010_v57 }
 0x1f0   :  { %v992_v25 = vpop.f32.mrf.mxu2 }
 0x1f1   :  { %1048 = vst [vmem:[#allocation8 + $0xe0] sm:$0xff] %v1011_v30  ;;  %v950_v63 = vpop.f32.mrf.mxu0  ;;  %v993_v39 = vadd.f32 %v2376_v27, %v992_v25 }
 0x1f2   :  { %v951_v0 = vadd.f32 %v2376_v27, %v950_v63 }
 0x1f3   :  { %1041 = vst [vmem:[#allocation8 + $0xa8] sm:$0xff] %v993_v39 }
 0x1f4   :  { %v970_v41 = vpop.f32.mrf.mxu1  ;;  %1024 = vst [vmem:[#allocation8 + $0x20] sm:$0xff] %v951_v0 }
 0x1f5   :  { %v971_v49 = vadd.f32 %v2376_v27, %v970_v41 }
 0x1f6   :  { %v1012_v9 = vpop.f32.mrf.mxu3 }
 0x1f7   :  { %1032 = vst [vmem:[#allocation8 + $0x60] sm:$0xff] %v971_v49  ;;  %v1013_v32 = vadd.f32 %v2376_v27, %v1012_v9 }
 0x1f9   :  { %1049 = vst [vmem:[#allocation8 + $0xe8] sm:$0xff] %v1013_v32  ;;  %v952_v46 = vpop.f32.mrf.mxu0 }
 0x1fa   :  { %v953_v5 = vadd.f32 %v2376_v27, %v952_v46 }
 0x1fc   :  { %v972_v44 = vpop.f32.mrf.mxu1  ;;  %1025 = vst [vmem:[#allocation8 + $0x28] sm:$0xff] %v953_v5  ;;  %v995_v2 = vpop.f32.mrf.mxu2 }
 0x1fd   :  { %v973_v18 = vadd.f32 %v2376_v27, %v972_v44  ;;  %v996_v52 = vadd.f32 %v2376_v27, %v995_v2 }
 0x1ff   :  { %1033 = vst [vmem:[#allocation8 + $0x68] sm:$0xff] %v973_v18 }
 0x200   :  { %1042 = vst [vmem:[#allocation8 + $0xb0] sm:$0xff] %v996_v52 }
 0x201   :  { %v955_v54 = vpop.f32.mrf.mxu0 }
 0x202   :  { %v1015_v13 = vpop.f32.mrf.mxu3  ;;  %v956_v29 = vadd.f32 %v2376_v27, %v955_v54 }
 0x203   :  { %v1016_v60 = vadd.f32 %v2376_v27, %v1015_v13 }
 0x204   :  { %v997_v11 = vpop.f32.mrf.mxu2  ;;  %v975_v33 = vpop.f32.mrf.mxu1  ;;  %1026 = vst [vmem:[#allocation8 + $0x30] sm:$0xff] %v956_v29 }
 0x205   :  { %1050 = vst [vmem:[#allocation8 + $0xf0] sm:$0xff] %v1016_v60  ;;  %v998_v21 = vadd.f32 %v2376_v27, %v997_v11  ;;  %v976_v6 = vadd.f32 %v2376_v27, %v975_v33 }
 0x207   :  { %1043 = vst [vmem:[#allocation8 + $0xb8] sm:$0xff] %v998_v21 }
 0x208   :  { %1034 = vst [vmem:[#allocation8 + $0x70] sm:$0xff] %v976_v6 }
 0x209   :  { %v957_v55 = vpop.f32.mrf.mxu0 }
 0x20a   :  { %v1017_v26 = vpop.f32.mrf.mxu3  ;;  %v958_v56 = vadd.f32 %v2376_v27, %v957_v55 }
 0x20b   :  { %v1018_v17 = vadd.f32 %v2376_v27, %v1017_v26 }
 0x20c   :  { %v977_v47 = vpop.f32.mrf.mxu1  ;;  %1027 = vst [vmem:[#allocation8 + $0x38] sm:$0xff] %v958_v56 }
 0x20d   :  { %1051 = vst [vmem:[#allocation8 + $0xf8] sm:$0xff] %v1018_v17  ;;  %v978_v61 = vadd.f32 %v2376_v27, %v977_v47 }
 0x20f   :  { %1035 = vst [vmem:[#allocation8 + $0x78] sm:$0xff] %v978_v61 }
 0x210   :  { %1064 = dma.vmem_to_hbm [thread:$0]  %s1057_s12, 4096, %s1059_s15, [#allocation4], %s1317_s28, %s1317_s28, %s1318_s29  }
 0x211   :  { %1313 = dma.done.wait [#allocation4], 4096  }
 0x212   :  { %1314 = vsyncadd [#allocation4], 4294963200 }
 0x213   :  { %1069 = vsyncpa [#allocation3], 1 }
 0x214   :  { %1070 = vsyncpa [#allocation6], 1 }
 0x215   :  { %1071 = vsyncpa [#allocation4], 1 }

</bundles_post_ra>
